<compile_context>
chip_gen: v7x
topology: tpu7x:2x2x1
jax: 0.10.0
libtpu: 0.0.40
codegen_flags: <defaults>
</compile_context>

<pallas_src>
import jax
import jax.numpy as jnp
from jax.experimental import pallas as pl
from jax.experimental.pallas import tpu as pltpu


def _round_up(x: int, m: int) -> int:
    return ((x + m - 1) // m) * m


# --------------------------------------------------------------------------------------
# Kernel 1: bidirectional GRU recurrence (+ fused summary Linear on the last timestep).
# Single program; the whole (tiny) problem is VMEM-resident. The sequence loop is a
# static Python loop (S is small & static) so every ref index / slice is static.
# --------------------------------------------------------------------------------------
def _bigru_kernel(x_ref,        # (S, B, D)   time-major inputs
                  wih_ref,      # (D, 6H)     [fwd | bwd] input->gates weights
                  bih_ref,      # (1, 6H)
                  whhf_ref,     # (H, 3H)     fwd hidden->gates
                  bhhf_ref,     # (1, 3H)
                  whhb_ref,     # (H, 3H)     bwd hidden->gates
                  bhhb_ref,     # (1, 3H)
                  wsum_ref,     # (2H, Msum)  summary Linear
                  bsum_ref,     # (1, Msum)
                  outf_ref,     # (S, B, H)   forward-direction outputs
                  outb_ref,     # (S, B, H)   backward-direction outputs
                  summary_ref,  # (B, Msum)
                  ):
    S, B, D = x_ref.shape
    H = whhf_ref.shape[0]

    # One flattened MXU matmul covers both directions' input projections for all steps.
    x2d = x_ref[...].reshape(S * B, D)
    gx = jnp.dot(x2d, wih_ref[...], preferred_element_type=jnp.float32) + bih_ref[...]

    whh_f = whhf_ref[...]
    bhh_f = bhhf_ref[...]
    whh_b = whhb_ref[...]
    bhh_b = bhhb_ref[...]

    def gru_cell(gi, h, whh, bhh):
        # PyTorch GRU gate order: r, z, n.  n uses r * (W_hn h + b_hn).
        gh = jnp.dot(h, whh, preferred_element_type=jnp.float32) + bhh
        r = jax.nn.sigmoid(gi[:, :H] + gh[:, :H])
        z = jax.nn.sigmoid(gi[:, H:2 * H] + gh[:, H:2 * H])
        n = jnp.tanh(gi[:, 2 * H:] + r * gh[:, 2 * H:])
        return (1.0 - z) * n + z * h

    hf = jnp.zeros((B, H), jnp.float32)
    hb = jnp.zeros((B, H), jnp.float32)
    hb_at_last_pos = None  # backward hidden at original position S-1 (first bwd step)

    for t in range(S):               # static unrolled loop; indices/slices are static
        tb = S - 1 - t
        gi_f = gx[t * B:(t + 1) * B, :3 * H]
        gi_b = gx[tb * B:(tb + 1) * B, 3 * H:]
        hf = gru_cell(gi_f, hf, whh_f, bhh_f)
        hb = gru_cell(gi_b, hb, whh_b, bhh_b)
        outf_ref[t] = hf
        outb_ref[tb] = hb
        if t == 0:
            hb_at_last_pos = hb

    # Summary Linear on outputs[:, -1] = [fwd hidden after full seq | bwd hidden at pos S-1].
    last = jnp.concatenate([hf, hb_at_last_pos], axis=-1)           # (B, 2H)
    summary_ref[...] = (jnp.dot(last, wsum_ref[...],
                                preferred_element_type=jnp.float32)
                        + bsum_ref[...]).astype(summary_ref.dtype)


# --------------------------------------------------------------------------------------
# Kernel 2: per-token memory_tokens Linear as one flattened, row-tiled 2-D matmul.
# --------------------------------------------------------------------------------------
def _rowwise_linear_kernel(x_ref, w_ref, b_ref, o_ref):
    o_ref[...] = (jnp.dot(x_ref[...], w_ref[...],
                          preferred_element_type=jnp.float32)
                  + b_ref[...]).astype(o_ref.dtype)


def rnn_seq_encoder(seqs: jax.Array, params: dict, *, tm: int = 256):
    """Forward pass of RNNSeqEncoder. Returns (summary (B, Msum), memory_tokens (B, S, M))."""
    B, S, D = seqs.shape
    H = params["whh_f"].shape[0]
    M = params["w_mem"].shape[1]
    MSUM = params["w_sum"].shape[1]

    # Fuse both directions' input-projection weights -> one (D, 6H) matmul operand.
    wih = jnp.concatenate([params["wih_f"], params["wih_b"]], axis=1)   # (D, 6H)
    bih = jnp.concatenate([params["bih_f"], params["bih_b"]], axis=1)   # (1, 6H)

    x_sbd = jnp.transpose(seqs, (1, 0, 2)).astype(jnp.float32)          # (S, B, D)

    out_f, out_b, summary = pl.pallas_call(
        _bigru_kernel,
        out_shape=(
            jax.ShapeDtypeStruct((S, B, H), jnp.float32),
            jax.ShapeDtypeStruct((S, B, H), jnp.float32),
            jax.ShapeDtypeStruct((B, MSUM), jnp.float32),
        ),
        in_specs=[pl.BlockSpec(memory_space=pltpu.MemorySpace.VMEM)] * 9,
        out_specs=(pl.BlockSpec(memory_space=pltpu.MemorySpace.VMEM),) * 3,
        compiler_params=pltpu.CompilerParams(vmem_limit_bytes=32 * 1024 * 1024),
    )(x_sbd, wih, bih,
      params["whh_f"], params["bhh_f"],
      params["whh_b"], params["bhh_b"],
      params["w_sum"], params["b_sum"])

    # ---- memory_tokens Linear: flatten to 2-D, tile rows, pipeline HBM<->VMEM ----
    out_sb = jnp.concatenate([out_f, out_b], axis=-1).reshape(S * B, 2 * H)  # (S*B, 2H)
    n_rows = S * B
    tm = max(8, (tm // 8) * 8)                       # keep the sublane dim 8-aligned
    tm_eff = min(tm, _round_up(n_rows, 8))
    n_pad = _round_up(n_rows, tm_eff)
    x2d = out_sb if n_pad == n_rows else jnp.pad(out_sb, ((0, n_pad - n_rows), (0, 0)))

    mem2d = pl.pallas_call(
        _rowwise_linear_kernel,
        out_shape=jax.ShapeDtypeStruct((n_pad, M), jnp.float32),
        grid=(n_pad // tm_eff,),
        in_specs=[
            pl.BlockSpec((tm_eff, 2 * H), lambda i: (i, 0)),   # row tile of activations
            pl.BlockSpec((2 * H, M), lambda i: (0, 0)),        # resident weight
            pl.BlockSpec((1, M), lambda i: (0, 0)),            # resident bias (hoisted)
        ],
        out_specs=pl.BlockSpec((tm_eff, M), lambda i: (i, 0)),
        compiler_params=pltpu.CompilerParams(
            dimension_semantics=("parallel",),
            vmem_limit_bytes=32 * 1024 * 1024,
        ),
    )(x2d, params["w_mem"], params["b_mem"])

    memory_tokens = mem2d[:n_rows].reshape(S, B, M).transpose(1, 0, 2)  # (B, S, M)
    return summary, memory_tokens


# --------------------------------------------------------------------------------------
# Pure-JAX reference (mirrors torch.nn.GRU bidirectional + the two Linears).
# --------------------------------------------------------------------------------------
def ref_forward(seqs, p):
    B, S, D = seqs.shape
    H = p["whh_f"].shape[0]

    def run_dir(wih, whh, bih, bhh, reverse):
        h = jnp.zeros((B, H), jnp.float32)
        outs = [None] * S
        order = range(S - 1, -1, -1) if reverse else range(S)
        for t in order:
            gi = seqs[:, t] @ wih + bih
            gh = h @ whh + bhh
            r = jax.nn.sigmoid(gi[:, :H] + gh[:, :H])
            z = jax.nn.sigmoid(gi[:, H:2 * H] + gh[:, H:2 * H])
            n = jnp.tanh(gi[:, 2 * H:] + r * gh[:, 2 * H:])
            h = (1.0 - z) * n + z * h
            outs[t] = h
        return jnp.stack(outs, axis=1)                      # (B, S, H)

    out_f = run_dir(p["wih_f"], p["whh_f"], p["bih_f"], p["bhh_f"], False)
    out_b = run_dir(p["wih_b"], p["whh_b"], p["bih_b"], p["bhh_b"], True)
    outputs = jnp.concatenate([out_f, out_b], axis=-1)      # (B, S, 2H)
    last = outputs[:, -1]
    memory = outputs @ p["w_mem"] + p["b_mem"]
    summary = last @ p["w_sum"] + p["b_sum"]
    return summary, memory


if __name__ == "__main__":
    # Small shapes consistent with the module interface.
    B, S, D, H = 2, 8, 32, 32          # batch, seq_len, input_dims, GRU hidden per dir
    M, MSUM = 32, 32                   # memory_tokens_size, summary_size

    key = jax.random.PRNGKey(0)
    ks = jax.random.split(key, 13)
    bound = 1.0 / jnp.sqrt(jnp.float32(H))

    def u(k, shape):
        return jax.random.uniform(k, shape, minval=-bound, maxval=bound, dtype=jnp.float32)

    seqs = jax.random.normal(ks[0], (B, S, D), dtype=jnp.float32)
    params = dict(
        wih_f=u(ks[1], (D, 3 * H)),  bih_f=u(ks[2], (1, 3 * H)),
        whh_f=u(ks[3], (H, 3 * H)),  bhh_f=u(ks[4], (1, 3 * H)),
        wih_b=u(ks[5], (D, 3 * H)),  bih_b=u(ks[6], (1, 3 * H)),
        whh_b=u(ks[7], (H, 3 * H)),  bhh_b=u(ks[8], (1, 3 * H)),
        w_mem=u(ks[9], (2 * H, M)),  b_mem=u(ks[10], (1, M)),
        w_sum=u(ks[11], (2 * H, MSUM)), b_sum=u(ks[12], (1, MSUM)),
    )

    # tm=8 -> a 2-step row grid at this toy size, exercising the pipelined path.
    summary, memory_tokens = rnn_seq_encoder(seqs, params, tm=8)
    jax.block_until_ready((summary, memory_tokens))

    ref_summary, ref_memory = ref_forward(seqs, params)
    assert summary.shape == (B, MSUM)
    assert memory_tokens.shape == (B, S, M)
    assert jnp.allclose(summary, ref_summary, atol=5e-4, rtol=5e-4), \
        float(jnp.max(jnp.abs(summary - ref_summary)))
    assert jnp.allclose(memory_tokens, ref_memory, atol=5e-4, rtol=5e-4), \
        float(jnp.max(jnp.abs(memory_tokens - ref_memory)))

    print("KERNEL_OK")
</pallas_src>

<mosaic_0001>
module attributes {stable_mosaic.version = 11 : i64} {
  func.func @_bigru_kernel(%arg0: memref<8x2x32xf32, #tpu.memory_space<vmem>>, %arg1: memref<32x192xf32, #tpu.memory_space<vmem>>, %arg2: memref<1x192xf32, #tpu.memory_space<vmem>>, %arg3: memref<32x96xf32, #tpu.memory_space<vmem>>, %arg4: memref<1x96xf32, #tpu.memory_space<vmem>>, %arg5: memref<32x96xf32, #tpu.memory_space<vmem>>, %arg6: memref<1x96xf32, #tpu.memory_space<vmem>>, %arg7: memref<64x32xf32, #tpu.memory_space<vmem>>, %arg8: memref<1x32xf32, #tpu.memory_space<vmem>>, %arg9: memref<8x2x32xf32, #tpu.memory_space<vmem>>, %arg10: memref<8x2x32xf32, #tpu.memory_space<vmem>>, %arg11: memref<2x32xf32, #tpu.memory_space<vmem>>) attributes {dimension_semantics = [], scalar_prefetch = 0 : i64, scratch_operands = 0 : i64, tpu.core_type = #tpu.core_type<tc>} {
    %c0 = arith.constant 0 : index
    %c0_0 = arith.constant 0 : index
    %c0_1 = arith.constant 0 : index
    %0 = vector.load %arg0[%c0, %c0_0, %c0_1] : memref<8x2x32xf32, #tpu.memory_space<vmem>>, vector<8x2x32xf32>
    %1 = vector.shape_cast %0 : vector<8x2x32xf32> to vector<16x32xf32>
    %c0_2 = arith.constant 0 : index
    %c0_3 = arith.constant 0 : index
    %2 = vector.load %arg1[%c0_2, %c0_3] : memref<32x192xf32, #tpu.memory_space<vmem>>, vector<32x192xf32>
    %cst = arith.constant dense<0.000000e+00> : vector<16x192xf32>
    %3 = tpu.matmul %1, %2, %cst {dimension_numbers = #tpu.dot_dimension_numbers<[1], [0], [0], [1], [0, 0, 1, 1], [], []>} : vector<16x32xf32>, vector<32x192xf32>, vector<16x192xf32> -> vector<16x192xf32>
    %c0_4 = arith.constant 0 : index
    %c0_5 = arith.constant 0 : index
    %4 = vector.load %arg2[%c0_4, %c0_5] : memref<1x192xf32, #tpu.memory_space<vmem>>, vector<1x192xf32>
    %5 = vector.broadcast %4 : vector<1x192xf32> to vector<16x192xf32>
    %6 = arith.addf %3, %5 : vector<16x192xf32>
    %c0_6 = arith.constant 0 : index
    %c0_7 = arith.constant 0 : index
    %7 = vector.load %arg3[%c0_6, %c0_7] : memref<32x96xf32, #tpu.memory_space<vmem>>, vector<32x96xf32>
    %c0_8 = arith.constant 0 : index
    %c0_9 = arith.constant 0 : index
    %8 = vector.load %arg4[%c0_8, %c0_9] : memref<1x96xf32, #tpu.memory_space<vmem>>, vector<1x96xf32>
    %c0_10 = arith.constant 0 : index
    %c0_11 = arith.constant 0 : index
    %9 = vector.load %arg5[%c0_10, %c0_11] : memref<32x96xf32, #tpu.memory_space<vmem>>, vector<32x96xf32>
    %c0_12 = arith.constant 0 : index
    %c0_13 = arith.constant 0 : index
    %10 = vector.load %arg6[%c0_12, %c0_13] : memref<1x96xf32, #tpu.memory_space<vmem>>, vector<1x96xf32>
    %cst_14 = arith.constant 0.000000e+00 : f32
    %11 = vector.broadcast %cst_14 : f32 to vector<2x32xf32>
    %cst_15 = arith.constant 0.000000e+00 : f32
    %12 = vector.broadcast %cst_15 : f32 to vector<2x32xf32>
    %13 = vector.extract_strided_slice %6 {offsets = [0, 0], sizes = [2, 96], strides = [1, 1]} : vector<16x192xf32> to vector<2x96xf32>
    %14 = vector.extract_strided_slice %6 {offsets = [14, 96], sizes = [2, 96], strides = [1, 1]} : vector<16x192xf32> to vector<2x96xf32>
    %cst_16 = arith.constant dense<0.000000e+00> : vector<2x96xf32>
    %15 = tpu.matmul %11, %7, %cst_16 {dimension_numbers = #tpu.dot_dimension_numbers<[1], [0], [0], [1], [0, 0, 1, 1], [], []>} : vector<2x32xf32>, vector<32x96xf32>, vector<2x96xf32> -> vector<2x96xf32>
    %16 = vector.broadcast %8 : vector<1x96xf32> to vector<2x96xf32>
    %17 = arith.addf %15, %16 : vector<2x96xf32>
    %18 = vector.extract_strided_slice %13 {offsets = [0, 0], sizes = [2, 32], strides = [1, 1]} : vector<2x96xf32> to vector<2x32xf32>
    %19 = vector.extract_strided_slice %17 {offsets = [0, 0], sizes = [2, 32], strides = [1, 1]} : vector<2x96xf32> to vector<2x32xf32>
    %20 = arith.addf %18, %19 : vector<2x32xf32>
    %21 = arith.negf %20 : vector<2x32xf32>
    %22 = math.exp %21 : vector<2x32xf32>
    %cst_17 = arith.constant 1.000000e+00 : f32
    %23 = vector.broadcast %cst_17 : f32 to vector<2x32xf32>
    %24 = arith.addf %23, %22 : vector<2x32xf32>
    %25 = arith.divf %23, %24 : vector<2x32xf32>
    %26 = vector.extract_strided_slice %13 {offsets = [0, 32], sizes = [2, 32], strides = [1, 1]} : vector<2x96xf32> to vector<2x32xf32>
    %27 = vector.extract_strided_slice %17 {offsets = [0, 32], sizes = [2, 32], strides = [1, 1]} : vector<2x96xf32> to vector<2x32xf32>
    %28 = arith.addf %26, %27 : vector<2x32xf32>
    %29 = arith.negf %28 : vector<2x32xf32>
    %30 = math.exp %29 : vector<2x32xf32>
    %cst_18 = arith.constant 1.000000e+00 : f32
    %31 = vector.broadcast %cst_18 : f32 to vector<2x32xf32>
    %32 = arith.addf %31, %30 : vector<2x32xf32>
    %33 = arith.divf %31, %32 : vector<2x32xf32>
    %34 = vector.extract_strided_slice %13 {offsets = [0, 64], sizes = [2, 32], strides = [1, 1]} : vector<2x96xf32> to vector<2x32xf32>
    %35 = vector.extract_strided_slice %17 {offsets = [0, 64], sizes = [2, 32], strides = [1, 1]} : vector<2x96xf32> to vector<2x32xf32>
    %36 = arith.mulf %25, %35 : vector<2x32xf32>
    %37 = arith.addf %34, %36 : vector<2x32xf32>
    %38 = math.tanh %37 : vector<2x32xf32>
    %cst_19 = arith.constant 1.000000e+00 : f32
    %39 = vector.broadcast %cst_19 : f32 to vector<2x32xf32>
    %40 = arith.subf %39, %33 : vector<2x32xf32>
    %41 = arith.mulf %40, %38 : vector<2x32xf32>
    %42 = arith.mulf %33, %11 : vector<2x32xf32>
    %43 = arith.addf %41, %42 : vector<2x32xf32>
    %cst_20 = arith.constant dense<0.000000e+00> : vector<2x96xf32>
    %44 = tpu.matmul %12, %9, %cst_20 {dimension_numbers = #tpu.dot_dimension_numbers<[1], [0], [0], [1], [0, 0, 1, 1], [], []>} : vector<2x32xf32>, vector<32x96xf32>, vector<2x96xf32> -> vector<2x96xf32>
    %45 = vector.broadcast %10 : vector<1x96xf32> to vector<2x96xf32>
    %46 = arith.addf %44, %45 : vector<2x96xf32>
    %47 = vector.extract_strided_slice %14 {offsets = [0, 0], sizes = [2, 32], strides = [1, 1]} : vector<2x96xf32> to vector<2x32xf32>
    %48 = vector.extract_strided_slice %46 {offsets = [0, 0], sizes = [2, 32], strides = [1, 1]} : vector<2x96xf32> to vector<2x32xf32>
    %49 = arith.addf %47, %48 : vector<2x32xf32>
    %50 = arith.negf %49 : vector<2x32xf32>
    %51 = math.exp %50 : vector<2x32xf32>
    %cst_21 = arith.constant 1.000000e+00 : f32
    %52 = vector.broadcast %cst_21 : f32 to vector<2x32xf32>
    %53 = arith.addf %52, %51 : vector<2x32xf32>
    %54 = arith.divf %52, %53 : vector<2x32xf32>
    %55 = vector.extract_strided_slice %14 {offsets = [0, 32], sizes = [2, 32], strides = [1, 1]} : vector<2x96xf32> to vector<2x32xf32>
    %56 = vector.extract_strided_slice %46 {offsets = [0, 32], sizes = [2, 32], strides = [1, 1]} : vector<2x96xf32> to vector<2x32xf32>
    %57 = arith.addf %55, %56 : vector<2x32xf32>
    %58 = arith.negf %57 : vector<2x32xf32>
    %59 = math.exp %58 : vector<2x32xf32>
    %cst_22 = arith.constant 1.000000e+00 : f32
    %60 = vector.broadcast %cst_22 : f32 to vector<2x32xf32>
    %61 = arith.addf %60, %59 : vector<2x32xf32>
    %62 = arith.divf %60, %61 : vector<2x32xf32>
    %63 = vector.extract_strided_slice %14 {offsets = [0, 64], sizes = [2, 32], strides = [1, 1]} : vector<2x96xf32> to vector<2x32xf32>
    %64 = vector.extract_strided_slice %46 {offsets = [0, 64], sizes = [2, 32], strides = [1, 1]} : vector<2x96xf32> to vector<2x32xf32>
    %65 = arith.mulf %54, %64 : vector<2x32xf32>
    %66 = arith.addf %63, %65 : vector<2x32xf32>
    %67 = math.tanh %66 : vector<2x32xf32>
    %cst_23 = arith.constant 1.000000e+00 : f32
    %68 = vector.broadcast %cst_23 : f32 to vector<2x32xf32>
    %69 = arith.subf %68, %62 : vector<2x32xf32>
    %70 = arith.mulf %69, %67 : vector<2x32xf32>
    %71 = arith.mulf %62, %12 : vector<2x32xf32>
    %72 = arith.addf %70, %71 : vector<2x32xf32>
    %c0_24 = arith.constant 0 : index
    %c0_25 = arith.constant 0 : index
    %c0_26 = arith.constant 0 : index
    %73 = vector.load %arg9[%c0_24, %c0_25, %c0_26] : memref<8x2x32xf32, #tpu.memory_space<vmem>>, vector<1x2x32xf32>
    %74 = vector.shape_cast %73 : vector<1x2x32xf32> to vector<2x32xf32>
    %75 = vector.shape_cast %43 : vector<2x32xf32> to vector<1x2x32xf32>
    tpu.vector_store %arg9[%c0_24, %c0_25, %c0_26], %75 {strides = array<i32>} : memref<8x2x32xf32, #tpu.memory_space<vmem>>, vector<1x2x32xf32>,
    %c7 = arith.constant 7 : index
    %c0_27 = arith.constant 0 : index
    %c0_28 = arith.constant 0 : index
    %76 = vector.load %arg10[%c7, %c0_27, %c0_28] : memref<8x2x32xf32, #tpu.memory_space<vmem>>, vector<1x2x32xf32>
    %77 = vector.shape_cast %76 : vector<1x2x32xf32> to vector<2x32xf32>
    %78 = vector.shape_cast %72 : vector<2x32xf32> to vector<1x2x32xf32>
    tpu.vector_store %arg10[%c7, %c0_27, %c0_28], %78 {strides = array<i32>} : memref<8x2x32xf32, #tpu.memory_space<vmem>>, vector<1x2x32xf32>,
    %79 = vector.extract_strided_slice %6 {offsets = [2, 0], sizes = [2, 96], strides = [1, 1]} : vector<16x192xf32> to vector<2x96xf32>
    %80 = vector.extract_strided_slice %6 {offsets = [12, 96], sizes = [2, 96], strides = [1, 1]} : vector<16x192xf32> to vector<2x96xf32>
    %cst_29 = arith.constant dense<0.000000e+00> : vector<2x96xf32>
    %81 = tpu.matmul %43, %7, %cst_29 {dimension_numbers = #tpu.dot_dimension_numbers<[1], [0], [0], [1], [0, 0, 1, 1], [], []>} : vector<2x32xf32>, vector<32x96xf32>, vector<2x96xf32> -> vector<2x96xf32>
    %82 = vector.broadcast %8 : vector<1x96xf32> to vector<2x96xf32>
    %83 = arith.addf %81, %82 : vector<2x96xf32>
    %84 = vector.extract_strided_slice %79 {offsets = [0, 0], sizes = [2, 32], strides = [1, 1]} : vector<2x96xf32> to vector<2x32xf32>
    %85 = vector.extract_strided_slice %83 {offsets = [0, 0], sizes = [2, 32], strides = [1, 1]} : vector<2x96xf32> to vector<2x32xf32>
    %86 = arith.addf %84, %85 : vector<2x32xf32>
    %87 = arith.negf %86 : vector<2x32xf32>
    %88 = math.exp %87 : vector<2x32xf32>
    %cst_30 = arith.constant 1.000000e+00 : f32
    %89 = vector.broadcast %cst_30 : f32 to vector<2x32xf32>
    %90 = arith.addf %89, %88 : vector<2x32xf32>
    %91 = arith.divf %89, %90 : vector<2x32xf32>
    %92 = vector.extract_strided_slice %79 {offsets = [0, 32], sizes = [2, 32], strides = [1, 1]} : vector<2x96xf32> to vector<2x32xf32>
    %93 = vector.extract_strided_slice %83 {offsets = [0, 32], sizes = [2, 32], strides = [1, 1]} : vector<2x96xf32> to vector<2x32xf32>
    %94 = arith.addf %92, %93 : vector<2x32xf32>
    %95 = arith.negf %94 : vector<2x32xf32>
    %96 = math.exp %95 : vector<2x32xf32>
    %cst_31 = arith.constant 1.000000e+00 : f32
    %97 = vector.broadcast %cst_31 : f32 to vector<2x32xf32>
    %98 = arith.addf %97, %96 : vector<2x32xf32>
    %99 = arith.divf %97, %98 : vector<2x32xf32>
    %100 = vector.extract_strided_slice %79 {offsets = [0, 64], sizes = [2, 32], strides = [1, 1]} : vector<2x96xf32> to vector<2x32xf32>
    %101 = vector.extract_strided_slice %83 {offsets = [0, 64], sizes = [2, 32], strides = [1, 1]} : vector<2x96xf32> to vector<2x32xf32>
    %102 = arith.mulf %91, %101 : vector<2x32xf32>
    %103 = arith.addf %100, %102 : vector<2x32xf32>
    %104 = math.tanh %103 : vector<2x32xf32>
    %cst_32 = arith.constant 1.000000e+00 : f32
    %105 = vector.broadcast %cst_32 : f32 to vector<2x32xf32>
    %106 = arith.subf %105, %99 : vector<2x32xf32>
    %107 = arith.mulf %106, %104 : vector<2x32xf32>
    %108 = arith.mulf %99, %43 : vector<2x32xf32>
    %109 = arith.addf %107, %108 : vector<2x32xf32>
    %cst_33 = arith.constant dense<0.000000e+00> : vector<2x96xf32>
    %110 = tpu.matmul %72, %9, %cst_33 {dimension_numbers = #tpu.dot_dimension_numbers<[1], [0], [0], [1], [0, 0, 1, 1], [], []>} : vector<2x32xf32>, vector<32x96xf32>, vector<2x96xf32> -> vector<2x96xf32>
    %111 = vector.broadcast %10 : vector<1x96xf32> to vector<2x96xf32>
    %112 = arith.addf %110, %111 : vector<2x96xf32>
    %113 = vector.extract_strided_slice %80 {offsets = [0, 0], sizes = [2, 32], strides = [1, 1]} : vector<2x96xf32> to vector<2x32xf32>
    %114 = vector.extract_strided_slice %112 {offsets = [0, 0], sizes = [2, 32], strides = [1, 1]} : vector<2x96xf32> to vector<2x32xf32>
    %115 = arith.addf %113, %114 : vector<2x32xf32>
    %116 = arith.negf %115 : vector<2x32xf32>
    %117 = math.exp %116 : vector<2x32xf32>
    %cst_34 = arith.constant 1.000000e+00 : f32
    %118 = vector.broadcast %cst_34 : f32 to vector<2x32xf32>
    %119 = arith.addf %118, %117 : vector<2x32xf32>
    %120 = arith.divf %118, %119 : vector<2x32xf32>
    %121 = vector.extract_strided_slice %80 {offsets = [0, 32], sizes = [2, 32], strides = [1, 1]} : vector<2x96xf32> to vector<2x32xf32>
    %122 = vector.extract_strided_slice %112 {offsets = [0, 32], sizes = [2, 32], strides = [1, 1]} : vector<2x96xf32> to vector<2x32xf32>
    %123 = arith.addf %121, %122 : vector<2x32xf32>
    %124 = arith.negf %123 : vector<2x32xf32>
    %125 = math.exp %124 : vector<2x32xf32>
    %cst_35 = arith.constant 1.000000e+00 : f32
    %126 = vector.broadcast %cst_35 : f32 to vector<2x32xf32>
    %127 = arith.addf %126, %125 : vector<2x32xf32>
    %128 = arith.divf %126, %127 : vector<2x32xf32>
    %129 = vector.extract_strided_slice %80 {offsets = [0, 64], sizes = [2, 32], strides = [1, 1]} : vector<2x96xf32> to vector<2x32xf32>
    %130 = vector.extract_strided_slice %112 {offsets = [0, 64], sizes = [2, 32], strides = [1, 1]} : vector<2x96xf32> to vector<2x32xf32>
    %131 = arith.mulf %120, %130 : vector<2x32xf32>
    %132 = arith.addf %129, %131 : vector<2x32xf32>
    %133 = math.tanh %132 : vector<2x32xf32>
    %cst_36 = arith.constant 1.000000e+00 : f32
    %134 = vector.broadcast %cst_36 : f32 to vector<2x32xf32>
    %135 = arith.subf %134, %128 : vector<2x32xf32>
    %136 = arith.mulf %135, %133 : vector<2x32xf32>
    %137 = arith.mulf %128, %72 : vector<2x32xf32>
    %138 = arith.addf %136, %137 : vector<2x32xf32>
    %c1 = arith.constant 1 : index
    %c0_37 = arith.constant 0 : index
    %c0_38 = arith.constant 0 : index
    %139 = vector.load %arg9[%c1, %c0_37, %c0_38] : memref<8x2x32xf32, #tpu.memory_space<vmem>>, vector<1x2x32xf32>
    %140 = vector.shape_cast %139 : vector<1x2x32xf32> to vector<2x32xf32>
    %141 = vector.shape_cast %109 : vector<2x32xf32> to vector<1x2x32xf32>
    tpu.vector_store %arg9[%c1, %c0_37, %c0_38], %141 {strides = array<i32>} : memref<8x2x32xf32, #tpu.memory_space<vmem>>, vector<1x2x32xf32>,
    %c6 = arith.constant 6 : index
    %c0_39 = arith.constant 0 : index
    %c0_40 = arith.constant 0 : index
    %142 = vector.load %arg10[%c6, %c0_39, %c0_40] : memref<8x2x32xf32, #tpu.memory_space<vmem>>, vector<1x2x32xf32>
    %143 = vector.shape_cast %142 : vector<1x2x32xf32> to vector<2x32xf32>
    %144 = vector.shape_cast %138 : vector<2x32xf32> to vector<1x2x32xf32>
    tpu.vector_store %arg10[%c6, %c0_39, %c0_40], %144 {strides = array<i32>} : memref<8x2x32xf32, #tpu.memory_space<vmem>>, vector<1x2x32xf32>,
    %145 = vector.extract_strided_slice %6 {offsets = [4, 0], sizes = [2, 96], strides = [1, 1]} : vector<16x192xf32> to vector<2x96xf32>
    %146 = vector.extract_strided_slice %6 {offsets = [10, 96], sizes = [2, 96], strides = [1, 1]} : vector<16x192xf32> to vector<2x96xf32>
    %cst_41 = arith.constant dense<0.000000e+00> : vector<2x96xf32>
    %147 = tpu.matmul %109, %7, %cst_41 {dimension_numbers = #tpu.dot_dimension_numbers<[1], [0], [0], [1], [0, 0, 1, 1], [], []>} : vector<2x32xf32>, vector<32x96xf32>, vector<2x96xf32> -> vector<2x96xf32>
    %148 = vector.broadcast %8 : vector<1x96xf32> to vector<2x96xf32>
    %149 = arith.addf %147, %148 : vector<2x96xf32>
    %150 = vector.extract_strided_slice %145 {offsets = [0, 0], sizes = [2, 32], strides = [1, 1]} : vector<2x96xf32> to vector<2x32xf32>
    %151 = vector.extract_strided_slice %149 {offsets = [0, 0], sizes = [2, 32], strides = [1, 1]} : vector<2x96xf32> to vector<2x32xf32>
    %152 = arith.addf %150, %151 : vector<2x32xf32>
    %153 = arith.negf %152 : vector<2x32xf32>
    %154 = math.exp %153 : vector<2x32xf32>
    %cst_42 = arith.constant 1.000000e+00 : f32
    %155 = vector.broadcast %cst_42 : f32 to vector<2x32xf32>
    %156 = arith.addf %155, %154 : vector<2x32xf32>
    %157 = arith.divf %155, %156 : vector<2x32xf32>
    %158 = vector.extract_strided_slice %145 {offsets = [0, 32], sizes = [2, 32], strides = [1, 1]} : vector<2x96xf32> to vector<2x32xf32>
    %159 = vector.extract_strided_slice %149 {offsets = [0, 32], sizes = [2, 32], strides = [1, 1]} : vector<2x96xf32> to vector<2x32xf32>
    %160 = arith.addf %158, %159 : vector<2x32xf32>
    %161 = arith.negf %160 : vector<2x32xf32>
    %162 = math.exp %161 : vector<2x32xf32>
    %cst_43 = arith.constant 1.000000e+00 : f32
    %163 = vector.broadcast %cst_43 : f32 to vector<2x32xf32>
    %164 = arith.addf %163, %162 : vector<2x32xf32>
    %165 = arith.divf %163, %164 : vector<2x32xf32>
    %166 = vector.extract_strided_slice %145 {offsets = [0, 64], sizes = [2, 32], strides = [1, 1]} : vector<2x96xf32> to vector<2x32xf32>
    %167 = vector.extract_strided_slice %149 {offsets = [0, 64], sizes = [2, 32], strides = [1, 1]} : vector<2x96xf32> to vector<2x32xf32>
    %168 = arith.mulf %157, %167 : vector<2x32xf32>
    %169 = arith.addf %166, %168 : vector<2x32xf32>
    %170 = math.tanh %169 : vector<2x32xf32>
    %cst_44 = arith.constant 1.000000e+00 : f32
    %171 = vector.broadcast %cst_44 : f32 to vector<2x32xf32>
    %172 = arith.subf %171, %165 : vector<2x32xf32>
    %173 = arith.mulf %172, %170 : vector<2x32xf32>
    %174 = arith.mulf %165, %109 : vector<2x32xf32>
    %175 = arith.addf %173, %174 : vector<2x32xf32>
    %cst_45 = arith.constant dense<0.000000e+00> : vector<2x96xf32>
    %176 = tpu.matmul %138, %9, %cst_45 {dimension_numbers = #tpu.dot_dimension_numbers<[1], [0], [0], [1], [0, 0, 1, 1], [], []>} : vector<2x32xf32>, vector<32x96xf32>, vector<2x96xf32> -> vector<2x96xf32>
    %177 = vector.broadcast %10 : vector<1x96xf32> to vector<2x96xf32>
    %178 = arith.addf %176, %177 : vector<2x96xf32>
    %179 = vector.extract_strided_slice %146 {offsets = [0, 0], sizes = [2, 32], strides = [1, 1]} : vector<2x96xf32> to vector<2x32xf32>
    %180 = vector.extract_strided_slice %178 {offsets = [0, 0], sizes = [2, 32], strides = [1, 1]} : vector<2x96xf32> to vector<2x32xf32>
    %181 = arith.addf %179, %180 : vector<2x32xf32>
    %182 = arith.negf %181 : vector<2x32xf32>
    %183 = math.exp %182 : vector<2x32xf32>
    %cst_46 = arith.constant 1.000000e+00 : f32
    %184 = vector.broadcast %cst_46 : f32 to vector<2x32xf32>
    %185 = arith.addf %184, %183 : vector<2x32xf32>
    %186 = arith.divf %184, %185 : vector<2x32xf32>
    %187 = vector.extract_strided_slice %146 {offsets = [0, 32], sizes = [2, 32], strides = [1, 1]} : vector<2x96xf32> to vector<2x32xf32>
    %188 = vector.extract_strided_slice %178 {offsets = [0, 32], sizes = [2, 32], strides = [1, 1]} : vector<2x96xf32> to vector<2x32xf32>
    %189 = arith.addf %187, %188 : vector<2x32xf32>
    %190 = arith.negf %189 : vector<2x32xf32>
    %191 = math.exp %190 : vector<2x32xf32>
    %cst_47 = arith.constant 1.000000e+00 : f32
    %192 = vector.broadcast %cst_47 : f32 to vector<2x32xf32>
    %193 = arith.addf %192, %191 : vector<2x32xf32>
    %194 = arith.divf %192, %193 : vector<2x32xf32>
    %195 = vector.extract_strided_slice %146 {offsets = [0, 64], sizes = [2, 32], strides = [1, 1]} : vector<2x96xf32> to vector<2x32xf32>
    %196 = vector.extract_strided_slice %178 {offsets = [0, 64], sizes = [2, 32], strides = [1, 1]} : vector<2x96xf32> to vector<2x32xf32>
    %197 = arith.mulf %186, %196 : vector<2x32xf32>
    %198 = arith.addf %195, %197 : vector<2x32xf32>
    %199 = math.tanh %198 : vector<2x32xf32>
    %cst_48 = arith.constant 1.000000e+00 : f32
    %200 = vector.broadcast %cst_48 : f32 to vector<2x32xf32>
    %201 = arith.subf %200, %194 : vector<2x32xf32>
    %202 = arith.mulf %201, %199 : vector<2x32xf32>
    %203 = arith.mulf %194, %138 : vector<2x32xf32>
    %204 = arith.addf %202, %203 : vector<2x32xf32>
    %c2 = arith.constant 2 : index
    %c0_49 = arith.constant 0 : index
    %c0_50 = arith.constant 0 : index
    %205 = vector.load %arg9[%c2, %c0_49, %c0_50] : memref<8x2x32xf32, #tpu.memory_space<vmem>>, vector<1x2x32xf32>
    %206 = vector.shape_cast %205 : vector<1x2x32xf32> to vector<2x32xf32>
    %207 = vector.shape_cast %175 : vector<2x32xf32> to vector<1x2x32xf32>
    tpu.vector_store %arg9[%c2, %c0_49, %c0_50], %207 {strides = array<i32>} : memref<8x2x32xf32, #tpu.memory_space<vmem>>, vector<1x2x32xf32>,
    %c5 = arith.constant 5 : index
    %c0_51 = arith.constant 0 : index
    %c0_52 = arith.constant 0 : index
    %208 = vector.load %arg10[%c5, %c0_51, %c0_52] : memref<8x2x32xf32, #tpu.memory_space<vmem>>, vector<1x2x32xf32>
    %209 = vector.shape_cast %208 : vector<1x2x32xf32> to vector<2x32xf32>
    %210 = vector.shape_cast %204 : vector<2x32xf32> to vector<1x2x32xf32>
    tpu.vector_store %arg10[%c5, %c0_51, %c0_52], %210 {strides = array<i32>} : memref<8x2x32xf32, #tpu.memory_space<vmem>>, vector<1x2x32xf32>,
    %211 = vector.extract_strided_slice %6 {offsets = [6, 0], sizes = [2, 96], strides = [1, 1]} : vector<16x192xf32> to vector<2x96xf32>
    %212 = vector.extract_strided_slice %6 {offsets = [8, 96], sizes = [2, 96], strides = [1, 1]} : vector<16x192xf32> to vector<2x96xf32>
    %cst_53 = arith.constant dense<0.000000e+00> : vector<2x96xf32>
    %213 = tpu.matmul %175, %7, %cst_53 {dimension_numbers = #tpu.dot_dimension_numbers<[1], [0], [0], [1], [0, 0, 1, 1], [], []>} : vector<2x32xf32>, vector<32x96xf32>, vector<2x96xf32> -> vector<2x96xf32>
    %214 = vector.broadcast %8 : vector<1x96xf32> to vector<2x96xf32>
    %215 = arith.addf %213, %214 : vector<2x96xf32>
    %216 = vector.extract_strided_slice %211 {offsets = [0, 0], sizes = [2, 32], strides = [1, 1]} : vector<2x96xf32> to vector<2x32xf32>
    %217 = vector.extract_strided_slice %215 {offsets = [0, 0], sizes = [2, 32], strides = [1, 1]} : vector<2x96xf32> to vector<2x32xf32>
    %218 = arith.addf %216, %217 : vector<2x32xf32>
    %219 = arith.negf %218 : vector<2x32xf32>
    %220 = math.exp %219 : vector<2x32xf32>
    %cst_54 = arith.constant 1.000000e+00 : f32
    %221 = vector.broadcast %cst_54 : f32 to vector<2x32xf32>
    %222 = arith.addf %221, %220 : vector<2x32xf32>
    %223 = arith.divf %221, %222 : vector<2x32xf32>
    %224 = vector.extract_strided_slice %211 {offsets = [0, 32], sizes = [2, 32], strides = [1, 1]} : vector<2x96xf32> to vector<2x32xf32>
    %225 = vector.extract_strided_slice %215 {offsets = [0, 32], sizes = [2, 32], strides = [1, 1]} : vector<2x96xf32> to vector<2x32xf32>
    %226 = arith.addf %224, %225 : vector<2x32xf32>
    %227 = arith.negf %226 : vector<2x32xf32>
    %228 = math.exp %227 : vector<2x32xf32>
    %cst_55 = arith.constant 1.000000e+00 : f32
    %229 = vector.broadcast %cst_55 : f32 to vector<2x32xf32>
    %230 = arith.addf %229, %228 : vector<2x32xf32>
    %231 = arith.divf %229, %230 : vector<2x32xf32>
    %232 = vector.extract_strided_slice %211 {offsets = [0, 64], sizes = [2, 32], strides = [1, 1]} : vector<2x96xf32> to vector<2x32xf32>
    %233 = vector.extract_strided_slice %215 {offsets = [0, 64], sizes = [2, 32], strides = [1, 1]} : vector<2x96xf32> to vector<2x32xf32>
    %234 = arith.mulf %223, %233 : vector<2x32xf32>
    %235 = arith.addf %232, %234 : vector<2x32xf32>
    %236 = math.tanh %235 : vector<2x32xf32>
    %cst_56 = arith.constant 1.000000e+00 : f32
    %237 = vector.broadcast %cst_56 : f32 to vector<2x32xf32>
    %238 = arith.subf %237, %231 : vector<2x32xf32>
    %239 = arith.mulf %238, %236 : vector<2x32xf32>
    %240 = arith.mulf %231, %175 : vector<2x32xf32>
    %241 = arith.addf %239, %240 : vector<2x32xf32>
    %cst_57 = arith.constant dense<0.000000e+00> : vector<2x96xf32>
    %242 = tpu.matmul %204, %9, %cst_57 {dimension_numbers = #tpu.dot_dimension_numbers<[1], [0], [0], [1], [0, 0, 1, 1], [], []>} : vector<2x32xf32>, vector<32x96xf32>, vector<2x96xf32> -> vector<2x96xf32>
    %243 = vector.broadcast %10 : vector<1x96xf32> to vector<2x96xf32>
    %244 = arith.addf %242, %243 : vector<2x96xf32>
    %245 = vector.extract_strided_slice %212 {offsets = [0, 0], sizes = [2, 32], strides = [1, 1]} : vector<2x96xf32> to vector<2x32xf32>
    %246 = vector.extract_strided_slice %244 {offsets = [0, 0], sizes = [2, 32], strides = [1, 1]} : vector<2x96xf32> to vector<2x32xf32>
    %247 = arith.addf %245, %246 : vector<2x32xf32>
    %248 = arith.negf %247 : vector<2x32xf32>
    %249 = math.exp %248 : vector<2x32xf32>
    %cst_58 = arith.constant 1.000000e+00 : f32
    %250 = vector.broadcast %cst_58 : f32 to vector<2x32xf32>
    %251 = arith.addf %250, %249 : vector<2x32xf32>
    %252 = arith.divf %250, %251 : vector<2x32xf32>
    %253 = vector.extract_strided_slice %212 {offsets = [0, 32], sizes = [2, 32], strides = [1, 1]} : vector<2x96xf32> to vector<2x32xf32>
    %254 = vector.extract_strided_slice %244 {offsets = [0, 32], sizes = [2, 32], strides = [1, 1]} : vector<2x96xf32> to vector<2x32xf32>
    %255 = arith.addf %253, %254 : vector<2x32xf32>
    %256 = arith.negf %255 : vector<2x32xf32>
    %257 = math.exp %256 : vector<2x32xf32>
    %cst_59 = arith.constant 1.000000e+00 : f32
    %258 = vector.broadcast %cst_59 : f32 to vector<2x32xf32>
    %259 = arith.addf %258, %257 : vector<2x32xf32>
    %260 = arith.divf %258, %259 : vector<2x32xf32>
    %261 = vector.extract_strided_slice %212 {offsets = [0, 64], sizes = [2, 32], strides = [1, 1]} : vector<2x96xf32> to vector<2x32xf32>
    %262 = vector.extract_strided_slice %244 {offsets = [0, 64], sizes = [2, 32], strides = [1, 1]} : vector<2x96xf32> to vector<2x32xf32>
    %263 = arith.mulf %252, %262 : vector<2x32xf32>
    %264 = arith.addf %261, %263 : vector<2x32xf32>
    %265 = math.tanh %264 : vector<2x32xf32>
    %cst_60 = arith.constant 1.000000e+00 : f32
    %266 = vector.broadcast %cst_60 : f32 to vector<2x32xf32>
    %267 = arith.subf %266, %260 : vector<2x32xf32>
    %268 = arith.mulf %267, %265 : vector<2x32xf32>
    %269 = arith.mulf %260, %204 : vector<2x32xf32>
    %270 = arith.addf %268, %269 : vector<2x32xf32>
    %c3 = arith.constant 3 : index
    %c0_61 = arith.constant 0 : index
    %c0_62 = arith.constant 0 : index
    %271 = vector.load %arg9[%c3, %c0_61, %c0_62] : memref<8x2x32xf32, #tpu.memory_space<vmem>>, vector<1x2x32xf32>
    %272 = vector.shape_cast %271 : vector<1x2x32xf32> to vector<2x32xf32>
    %273 = vector.shape_cast %241 : vector<2x32xf32> to vector<1x2x32xf32>
    tpu.vector_store %arg9[%c3, %c0_61, %c0_62], %273 {strides = array<i32>} : memref<8x2x32xf32, #tpu.memory_space<vmem>>, vector<1x2x32xf32>,
    %c4 = arith.constant 4 : index
    %c0_63 = arith.constant 0 : index
    %c0_64 = arith.constant 0 : index
    %274 = vector.load %arg10[%c4, %c0_63, %c0_64] : memref<8x2x32xf32, #tpu.memory_space<vmem>>, vector<1x2x32xf32>
    %275 = vector.shape_cast %274 : vector<1x2x32xf32> to vector<2x32xf32>
    %276 = vector.shape_cast %270 : vector<2x32xf32> to vector<1x2x32xf32>
    tpu.vector_store %arg10[%c4, %c0_63, %c0_64], %276 {strides = array<i32>} : memref<8x2x32xf32, #tpu.memory_space<vmem>>, vector<1x2x32xf32>,
    %277 = vector.extract_strided_slice %6 {offsets = [8, 0], sizes = [2, 96], strides = [1, 1]} : vector<16x192xf32> to vector<2x96xf32>
    %278 = vector.extract_strided_slice %6 {offsets = [6, 96], sizes = [2, 96], strides = [1, 1]} : vector<16x192xf32> to vector<2x96xf32>
    %cst_65 = arith.constant dense<0.000000e+00> : vector<2x96xf32>
    %279 = tpu.matmul %241, %7, %cst_65 {dimension_numbers = #tpu.dot_dimension_numbers<[1], [0], [0], [1], [0, 0, 1, 1], [], []>} : vector<2x32xf32>, vector<32x96xf32>, vector<2x96xf32> -> vector<2x96xf32>
    %280 = vector.broadcast %8 : vector<1x96xf32> to vector<2x96xf32>
    %281 = arith.addf %279, %280 : vector<2x96xf32>
    %282 = vector.extract_strided_slice %277 {offsets = [0, 0], sizes = [2, 32], strides = [1, 1]} : vector<2x96xf32> to vector<2x32xf32>
    %283 = vector.extract_strided_slice %281 {offsets = [0, 0], sizes = [2, 32], strides = [1, 1]} : vector<2x96xf32> to vector<2x32xf32>
    %284 = arith.addf %282, %283 : vector<2x32xf32>
    %285 = arith.negf %284 : vector<2x32xf32>
    %286 = math.exp %285 : vector<2x32xf32>
    %cst_66 = arith.constant 1.000000e+00 : f32
    %287 = vector.broadcast %cst_66 : f32 to vector<2x32xf32>
    %288 = arith.addf %287, %286 : vector<2x32xf32>
    %289 = arith.divf %287, %288 : vector<2x32xf32>
    %290 = vector.extract_strided_slice %277 {offsets = [0, 32], sizes = [2, 32], strides = [1, 1]} : vector<2x96xf32> to vector<2x32xf32>
    %291 = vector.extract_strided_slice %281 {offsets = [0, 32], sizes = [2, 32], strides = [1, 1]} : vector<2x96xf32> to vector<2x32xf32>
    %292 = arith.addf %290, %291 : vector<2x32xf32>
    %293 = arith.negf %292 : vector<2x32xf32>
    %294 = math.exp %293 : vector<2x32xf32>
    %cst_67 = arith.constant 1.000000e+00 : f32
    %295 = vector.broadcast %cst_67 : f32 to vector<2x32xf32>
    %296 = arith.addf %295, %294 : vector<2x32xf32>
    %297 = arith.divf %295, %296 : vector<2x32xf32>
    %298 = vector.extract_strided_slice %277 {offsets = [0, 64], sizes = [2, 32], strides = [1, 1]} : vector<2x96xf32> to vector<2x32xf32>
    %299 = vector.extract_strided_slice %281 {offsets = [0, 64], sizes = [2, 32], strides = [1, 1]} : vector<2x96xf32> to vector<2x32xf32>
    %300 = arith.mulf %289, %299 : vector<2x32xf32>
    %301 = arith.addf %298, %300 : vector<2x32xf32>
    %302 = math.tanh %301 : vector<2x32xf32>
    %cst_68 = arith.constant 1.000000e+00 : f32
    %303 = vector.broadcast %cst_68 : f32 to vector<2x32xf32>
    %304 = arith.subf %303, %297 : vector<2x32xf32>
    %305 = arith.mulf %304, %302 : vector<2x32xf32>
    %306 = arith.mulf %297, %241 : vector<2x32xf32>
    %307 = arith.addf %305, %306 : vector<2x32xf32>
    %cst_69 = arith.constant dense<0.000000e+00> : vector<2x96xf32>
    %308 = tpu.matmul %270, %9, %cst_69 {dimension_numbers = #tpu.dot_dimension_numbers<[1], [0], [0], [1], [0, 0, 1, 1], [], []>} : vector<2x32xf32>, vector<32x96xf32>, vector<2x96xf32> -> vector<2x96xf32>
    %309 = vector.broadcast %10 : vector<1x96xf32> to vector<2x96xf32>
    %310 = arith.addf %308, %309 : vector<2x96xf32>
    %311 = vector.extract_strided_slice %278 {offsets = [0, 0], sizes = [2, 32], strides = [1, 1]} : vector<2x96xf32> to vector<2x32xf32>
    %312 = vector.extract_strided_slice %310 {offsets = [0, 0], sizes = [2, 32], strides = [1, 1]} : vector<2x96xf32> to vector<2x32xf32>
    %313 = arith.addf %311, %312 : vector<2x32xf32>
    %314 = arith.negf %313 : vector<2x32xf32>
    %315 = math.exp %314 : vector<2x32xf32>
    %cst_70 = arith.constant 1.000000e+00 : f32
    %316 = vector.broadcast %cst_70 : f32 to vector<2x32xf32>
    %317 = arith.addf %316, %315 : vector<2x32xf32>
    %318 = arith.divf %316, %317 : vector<2x32xf32>
    %319 = vector.extract_strided_slice %278 {offsets = [0, 32], sizes = [2, 32], strides = [1, 1]} : vector<2x96xf32> to vector<2x32xf32>
    %320 = vector.extract_strided_slice %310 {offsets = [0, 32], sizes = [2, 32], strides = [1, 1]} : vector<2x96xf32> to vector<2x32xf32>
    %321 = arith.addf %319, %320 : vector<2x32xf32>
    %322 = arith.negf %321 : vector<2x32xf32>
    %323 = math.exp %322 : vector<2x32xf32>
    %cst_71 = arith.constant 1.000000e+00 : f32
    %324 = vector.broadcast %cst_71 : f32 to vector<2x32xf32>
    %325 = arith.addf %324, %323 : vector<2x32xf32>
    %326 = arith.divf %324, %325 : vector<2x32xf32>
    %327 = vector.extract_strided_slice %278 {offsets = [0, 64], sizes = [2, 32], strides = [1, 1]} : vector<2x96xf32> to vector<2x32xf32>
    %328 = vector.extract_strided_slice %310 {offsets = [0, 64], sizes = [2, 32], strides = [1, 1]} : vector<2x96xf32> to vector<2x32xf32>
    %329 = arith.mulf %318, %328 : vector<2x32xf32>
    %330 = arith.addf %327, %329 : vector<2x32xf32>
    %331 = math.tanh %330 : vector<2x32xf32>
    %cst_72 = arith.constant 1.000000e+00 : f32
    %332 = vector.broadcast %cst_72 : f32 to vector<2x32xf32>
    %333 = arith.subf %332, %326 : vector<2x32xf32>
    %334 = arith.mulf %333, %331 : vector<2x32xf32>
    %335 = arith.mulf %326, %270 : vector<2x32xf32>
    %336 = arith.addf %334, %335 : vector<2x32xf32>
    %c4_73 = arith.constant 4 : index
    %c0_74 = arith.constant 0 : index
    %c0_75 = arith.constant 0 : index
    %337 = vector.load %arg9[%c4_73, %c0_74, %c0_75] : memref<8x2x32xf32, #tpu.memory_space<vmem>>, vector<1x2x32xf32>
    %338 = vector.shape_cast %337 : vector<1x2x32xf32> to vector<2x32xf32>
    %339 = vector.shape_cast %307 : vector<2x32xf32> to vector<1x2x32xf32>
    tpu.vector_store %arg9[%c4_73, %c0_74, %c0_75], %339 {strides = array<i32>} : memref<8x2x32xf32, #tpu.memory_space<vmem>>, vector<1x2x32xf32>,
    %c3_76 = arith.constant 3 : index
    %c0_77 = arith.constant 0 : index
    %c0_78 = arith.constant 0 : index
    %340 = vector.load %arg10[%c3_76, %c0_77, %c0_78] : memref<8x2x32xf32, #tpu.memory_space<vmem>>, vector<1x2x32xf32>
    %341 = vector.shape_cast %340 : vector<1x2x32xf32> to vector<2x32xf32>
    %342 = vector.shape_cast %336 : vector<2x32xf32> to vector<1x2x32xf32>
    tpu.vector_store %arg10[%c3_76, %c0_77, %c0_78], %342 {strides = array<i32>} : memref<8x2x32xf32, #tpu.memory_space<vmem>>, vector<1x2x32xf32>,
    %343 = vector.extract_strided_slice %6 {offsets = [10, 0], sizes = [2, 96], strides = [1, 1]} : vector<16x192xf32> to vector<2x96xf32>
    %344 = vector.extract_strided_slice %6 {offsets = [4, 96], sizes = [2, 96], strides = [1, 1]} : vector<16x192xf32> to vector<2x96xf32>
    %cst_79 = arith.constant dense<0.000000e+00> : vector<2x96xf32>
    %345 = tpu.matmul %307, %7, %cst_79 {dimension_numbers = #tpu.dot_dimension_numbers<[1], [0], [0], [1], [0, 0, 1, 1], [], []>} : vector<2x32xf32>, vector<32x96xf32>, vector<2x96xf32> -> vector<2x96xf32>
    %346 = vector.broadcast %8 : vector<1x96xf32> to vector<2x96xf32>
    %347 = arith.addf %345, %346 : vector<2x96xf32>
    %348 = vector.extract_strided_slice %343 {offsets = [0, 0], sizes = [2, 32], strides = [1, 1]} : vector<2x96xf32> to vector<2x32xf32>
    %349 = vector.extract_strided_slice %347 {offsets = [0, 0], sizes = [2, 32], strides = [1, 1]} : vector<2x96xf32> to vector<2x32xf32>
    %350 = arith.addf %348, %349 : vector<2x32xf32>
    %351 = arith.negf %350 : vector<2x32xf32>
    %352 = math.exp %351 : vector<2x32xf32>
    %cst_80 = arith.constant 1.000000e+00 : f32
    %353 = vector.broadcast %cst_80 : f32 to vector<2x32xf32>
    %354 = arith.addf %353, %352 : vector<2x32xf32>
    %355 = arith.divf %353, %354 : vector<2x32xf32>
    %356 = vector.extract_strided_slice %343 {offsets = [0, 32], sizes = [2, 32], strides = [1, 1]} : vector<2x96xf32> to vector<2x32xf32>
    %357 = vector.extract_strided_slice %347 {offsets = [0, 32], sizes = [2, 32], strides = [1, 1]} : vector<2x96xf32> to vector<2x32xf32>
    %358 = arith.addf %356, %357 : vector<2x32xf32>
    %359 = arith.negf %358 : vector<2x32xf32>
    %360 = math.exp %359 : vector<2x32xf32>
    %cst_81 = arith.constant 1.000000e+00 : f32
    %361 = vector.broadcast %cst_81 : f32 to vector<2x32xf32>
    %362 = arith.addf %361, %360 : vector<2x32xf32>
    %363 = arith.divf %361, %362 : vector<2x32xf32>
    %364 = vector.extract_strided_slice %343 {offsets = [0, 64], sizes = [2, 32], strides = [1, 1]} : vector<2x96xf32> to vector<2x32xf32>
    %365 = vector.extract_strided_slice %347 {offsets = [0, 64], sizes = [2, 32], strides = [1, 1]} : vector<2x96xf32> to vector<2x32xf32>
    %366 = arith.mulf %355, %365 : vector<2x32xf32>
    %367 = arith.addf %364, %366 : vector<2x32xf32>
    %368 = math.tanh %367 : vector<2x32xf32>
    %cst_82 = arith.constant 1.000000e+00 : f32
    %369 = vector.broadcast %cst_82 : f32 to vector<2x32xf32>
    %370 = arith.subf %369, %363 : vector<2x32xf32>
    %371 = arith.mulf %370, %368 : vector<2x32xf32>
    %372 = arith.mulf %363, %307 : vector<2x32xf32>
    %373 = arith.addf %371, %372 : vector<2x32xf32>
    %cst_83 = arith.constant dense<0.000000e+00> : vector<2x96xf32>
    %374 = tpu.matmul %336, %9, %cst_83 {dimension_numbers = #tpu.dot_dimension_numbers<[1], [0], [0], [1], [0, 0, 1, 1], [], []>} : vector<2x32xf32>, vector<32x96xf32>, vector<2x96xf32> -> vector<2x96xf32>
    %375 = vector.broadcast %10 : vector<1x96xf32> to vector<2x96xf32>
    %376 = arith.addf %374, %375 : vector<2x96xf32>
    %377 = vector.extract_strided_slice %344 {offsets = [0, 0], sizes = [2, 32], strides = [1, 1]} : vector<2x96xf32> to vector<2x32xf32>
    %378 = vector.extract_strided_slice %376 {offsets = [0, 0], sizes = [2, 32], strides = [1, 1]} : vector<2x96xf32> to vector<2x32xf32>
    %379 = arith.addf %377, %378 : vector<2x32xf32>
    %380 = arith.negf %379 : vector<2x32xf32>
    %381 = math.exp %380 : vector<2x32xf32>
    %cst_84 = arith.constant 1.000000e+00 : f32
    %382 = vector.broadcast %cst_84 : f32 to vector<2x32xf32>
    %383 = arith.addf %382, %381 : vector<2x32xf32>
    %384 = arith.divf %382, %383 : vector<2x32xf32>
    %385 = vector.extract_strided_slice %344 {offsets = [0, 32], sizes = [2, 32], strides = [1, 1]} : vector<2x96xf32> to vector<2x32xf32>
    %386 = vector.extract_strided_slice %376 {offsets = [0, 32], sizes = [2, 32], strides = [1, 1]} : vector<2x96xf32> to vector<2x32xf32>
    %387 = arith.addf %385, %386 : vector<2x32xf32>
    %388 = arith.negf %387 : vector<2x32xf32>
    %389 = math.exp %388 : vector<2x32xf32>
    %cst_85 = arith.constant 1.000000e+00 : f32
    %390 = vector.broadcast %cst_85 : f32 to vector<2x32xf32>
    %391 = arith.addf %390, %389 : vector<2x32xf32>
    %392 = arith.divf %390, %391 : vector<2x32xf32>
    %393 = vector.extract_strided_slice %344 {offsets = [0, 64], sizes = [2, 32], strides = [1, 1]} : vector<2x96xf32> to vector<2x32xf32>
    %394 = vector.extract_strided_slice %376 {offsets = [0, 64], sizes = [2, 32], strides = [1, 1]} : vector<2x96xf32> to vector<2x32xf32>
    %395 = arith.mulf %384, %394 : vector<2x32xf32>
    %396 = arith.addf %393, %395 : vector<2x32xf32>
    %397 = math.tanh %396 : vector<2x32xf32>
    %cst_86 = arith.constant 1.000000e+00 : f32
    %398 = vector.broadcast %cst_86 : f32 to vector<2x32xf32>
    %399 = arith.subf %398, %392 : vector<2x32xf32>
    %400 = arith.mulf %399, %397 : vector<2x32xf32>
    %401 = arith.mulf %392, %336 : vector<2x32xf32>
    %402 = arith.addf %400, %401 : vector<2x32xf32>
    %c5_87 = arith.constant 5 : index
    %c0_88 = arith.constant 0 : index
    %c0_89 = arith.constant 0 : index
    %403 = vector.load %arg9[%c5_87, %c0_88, %c0_89] : memref<8x2x32xf32, #tpu.memory_space<vmem>>, vector<1x2x32xf32>
    %404 = vector.shape_cast %403 : vector<1x2x32xf32> to vector<2x32xf32>
    %405 = vector.shape_cast %373 : vector<2x32xf32> to vector<1x2x32xf32>
    tpu.vector_store %arg9[%c5_87, %c0_88, %c0_89], %405 {strides = array<i32>} : memref<8x2x32xf32, #tpu.memory_space<vmem>>, vector<1x2x32xf32>,
    %c2_90 = arith.constant 2 : index
    %c0_91 = arith.constant 0 : index
    %c0_92 = arith.constant 0 : index
    %406 = vector.load %arg10[%c2_90, %c0_91, %c0_92] : memref<8x2x32xf32, #tpu.memory_space<vmem>>, vector<1x2x32xf32>
    %407 = vector.shape_cast %406 : vector<1x2x32xf32> to vector<2x32xf32>
    %408 = vector.shape_cast %402 : vector<2x32xf32> to vector<1x2x32xf32>
    tpu.vector_store %arg10[%c2_90, %c0_91, %c0_92], %408 {strides = array<i32>} : memref<8x2x32xf32, #tpu.memory_space<vmem>>, vector<1x2x32xf32>,
    %409 = vector.extract_strided_slice %6 {offsets = [12, 0], sizes = [2, 96], strides = [1, 1]} : vector<16x192xf32> to vector<2x96xf32>
    %410 = vector.extract_strided_slice %6 {offsets = [2, 96], sizes = [2, 96], strides = [1, 1]} : vector<16x192xf32> to vector<2x96xf32>
    %cst_93 = arith.constant dense<0.000000e+00> : vector<2x96xf32>
    %411 = tpu.matmul %373, %7, %cst_93 {dimension_numbers = #tpu.dot_dimension_numbers<[1], [0], [0], [1], [0, 0, 1, 1], [], []>} : vector<2x32xf32>, vector<32x96xf32>, vector<2x96xf32> -> vector<2x96xf32>
    %412 = vector.broadcast %8 : vector<1x96xf32> to vector<2x96xf32>
    %413 = arith.addf %411, %412 : vector<2x96xf32>
    %414 = vector.extract_strided_slice %409 {offsets = [0, 0], sizes = [2, 32], strides = [1, 1]} : vector<2x96xf32> to vector<2x32xf32>
    %415 = vector.extract_strided_slice %413 {offsets = [0, 0], sizes = [2, 32], strides = [1, 1]} : vector<2x96xf32> to vector<2x32xf32>
    %416 = arith.addf %414, %415 : vector<2x32xf32>
    %417 = arith.negf %416 : vector<2x32xf32>
    %418 = math.exp %417 : vector<2x32xf32>
    %cst_94 = arith.constant 1.000000e+00 : f32
    %419 = vector.broadcast %cst_94 : f32 to vector<2x32xf32>
    %420 = arith.addf %419, %418 : vector<2x32xf32>
    %421 = arith.divf %419, %420 : vector<2x32xf32>
    %422 = vector.extract_strided_slice %409 {offsets = [0, 32], sizes = [2, 32], strides = [1, 1]} : vector<2x96xf32> to vector<2x32xf32>
    %423 = vector.extract_strided_slice %413 {offsets = [0, 32], sizes = [2, 32], strides = [1, 1]} : vector<2x96xf32> to vector<2x32xf32>
    %424 = arith.addf %422, %423 : vector<2x32xf32>
    %425 = arith.negf %424 : vector<2x32xf32>
    %426 = math.exp %425 : vector<2x32xf32>
    %cst_95 = arith.constant 1.000000e+00 : f32
    %427 = vector.broadcast %cst_95 : f32 to vector<2x32xf32>
    %428 = arith.addf %427, %426 : vector<2x32xf32>
    %429 = arith.divf %427, %428 : vector<2x32xf32>
    %430 = vector.extract_strided_slice %409 {offsets = [0, 64], sizes = [2, 32], strides = [1, 1]} : vector<2x96xf32> to vector<2x32xf32>
    %431 = vector.extract_strided_slice %413 {offsets = [0, 64], sizes = [2, 32], strides = [1, 1]} : vector<2x96xf32> to vector<2x32xf32>
    %432 = arith.mulf %421, %431 : vector<2x32xf32>
    %433 = arith.addf %430, %432 : vector<2x32xf32>
    %434 = math.tanh %433 : vector<2x32xf32>
    %cst_96 = arith.constant 1.000000e+00 : f32
    %435 = vector.broadcast %cst_96 : f32 to vector<2x32xf32>
    %436 = arith.subf %435, %429 : vector<2x32xf32>
    %437 = arith.mulf %436, %434 : vector<2x32xf32>
    %438 = arith.mulf %429, %373 : vector<2x32xf32>
    %439 = arith.addf %437, %438 : vector<2x32xf32>
    %cst_97 = arith.constant dense<0.000000e+00> : vector<2x96xf32>
    %440 = tpu.matmul %402, %9, %cst_97 {dimension_numbers = #tpu.dot_dimension_numbers<[1], [0], [0], [1], [0, 0, 1, 1], [], []>} : vector<2x32xf32>, vector<32x96xf32>, vector<2x96xf32> -> vector<2x96xf32>
    %441 = vector.broadcast %10 : vector<1x96xf32> to vector<2x96xf32>
    %442 = arith.addf %440, %441 : vector<2x96xf32>
    %443 = vector.extract_strided_slice %410 {offsets = [0, 0], sizes = [2, 32], strides = [1, 1]} : vector<2x96xf32> to vector<2x32xf32>
    %444 = vector.extract_strided_slice %442 {offsets = [0, 0], sizes = [2, 32], strides = [1, 1]} : vector<2x96xf32> to vector<2x32xf32>
    %445 = arith.addf %443, %444 : vector<2x32xf32>
    %446 = arith.negf %445 : vector<2x32xf32>
    %447 = math.exp %446 : vector<2x32xf32>
    %cst_98 = arith.constant 1.000000e+00 : f32
    %448 = vector.broadcast %cst_98 : f32 to vector<2x32xf32>
    %449 = arith.addf %448, %447 : vector<2x32xf32>
    %450 = arith.divf %448, %449 : vector<2x32xf32>
    %451 = vector.extract_strided_slice %410 {offsets = [0, 32], sizes = [2, 32], strides = [1, 1]} : vector<2x96xf32> to vector<2x32xf32>
    %452 = vector.extract_strided_slice %442 {offsets = [0, 32], sizes = [2, 32], strides = [1, 1]} : vector<2x96xf32> to vector<2x32xf32>
    %453 = arith.addf %451, %452 : vector<2x32xf32>
    %454 = arith.negf %453 : vector<2x32xf32>
    %455 = math.exp %454 : vector<2x32xf32>
    %cst_99 = arith.constant 1.000000e+00 : f32
    %456 = vector.broadcast %cst_99 : f32 to vector<2x32xf32>
    %457 = arith.addf %456, %455 : vector<2x32xf32>
    %458 = arith.divf %456, %457 : vector<2x32xf32>
    %459 = vector.extract_strided_slice %410 {offsets = [0, 64], sizes = [2, 32], strides = [1, 1]} : vector<2x96xf32> to vector<2x32xf32>
    %460 = vector.extract_strided_slice %442 {offsets = [0, 64], sizes = [2, 32], strides = [1, 1]} : vector<2x96xf32> to vector<2x32xf32>
    %461 = arith.mulf %450, %460 : vector<2x32xf32>
    %462 = arith.addf %459, %461 : vector<2x32xf32>
    %463 = math.tanh %462 : vector<2x32xf32>
    %cst_100 = arith.constant 1.000000e+00 : f32
    %464 = vector.broadcast %cst_100 : f32 to vector<2x32xf32>
    %465 = arith.subf %464, %458 : vector<2x32xf32>
    %466 = arith.mulf %465, %463 : vector<2x32xf32>
    %467 = arith.mulf %458, %402 : vector<2x32xf32>
    %468 = arith.addf %466, %467 : vector<2x32xf32>
    %c6_101 = arith.constant 6 : index
    %c0_102 = arith.constant 0 : index
    %c0_103 = arith.constant 0 : index
    %469 = vector.load %arg9[%c6_101, %c0_102, %c0_103] : memref<8x2x32xf32, #tpu.memory_space<vmem>>, vector<1x2x32xf32>
    %470 = vector.shape_cast %469 : vector<1x2x32xf32> to vector<2x32xf32>
    %471 = vector.shape_cast %439 : vector<2x32xf32> to vector<1x2x32xf32>
    tpu.vector_store %arg9[%c6_101, %c0_102, %c0_103], %471 {strides = array<i32>} : memref<8x2x32xf32, #tpu.memory_space<vmem>>, vector<1x2x32xf32>,
    %c1_104 = arith.constant 1 : index
    %c0_105 = arith.constant 0 : index
    %c0_106 = arith.constant 0 : index
    %472 = vector.load %arg10[%c1_104, %c0_105, %c0_106] : memref<8x2x32xf32, #tpu.memory_space<vmem>>, vector<1x2x32xf32>
    %473 = vector.shape_cast %472 : vector<1x2x32xf32> to vector<2x32xf32>
    %474 = vector.shape_cast %468 : vector<2x32xf32> to vector<1x2x32xf32>
    tpu.vector_store %arg10[%c1_104, %c0_105, %c0_106], %474 {strides = array<i32>} : memref<8x2x32xf32, #tpu.memory_space<vmem>>, vector<1x2x32xf32>,
    %475 = vector.extract_strided_slice %6 {offsets = [14, 0], sizes = [2, 96], strides = [1, 1]} : vector<16x192xf32> to vector<2x96xf32>
    %476 = vector.extract_strided_slice %6 {offsets = [0, 96], sizes = [2, 96], strides = [1, 1]} : vector<16x192xf32> to vector<2x96xf32>
    %cst_107 = arith.constant dense<0.000000e+00> : vector<2x96xf32>
    %477 = tpu.matmul %439, %7, %cst_107 {dimension_numbers = #tpu.dot_dimension_numbers<[1], [0], [0], [1], [0, 0, 1, 1], [], []>} : vector<2x32xf32>, vector<32x96xf32>, vector<2x96xf32> -> vector<2x96xf32>
    %478 = vector.broadcast %8 : vector<1x96xf32> to vector<2x96xf32>
    %479 = arith.addf %477, %478 : vector<2x96xf32>
    %480 = vector.extract_strided_slice %475 {offsets = [0, 0], sizes = [2, 32], strides = [1, 1]} : vector<2x96xf32> to vector<2x32xf32>
    %481 = vector.extract_strided_slice %479 {offsets = [0, 0], sizes = [2, 32], strides = [1, 1]} : vector<2x96xf32> to vector<2x32xf32>
    %482 = arith.addf %480, %481 : vector<2x32xf32>
    %483 = arith.negf %482 : vector<2x32xf32>
    %484 = math.exp %483 : vector<2x32xf32>
    %cst_108 = arith.constant 1.000000e+00 : f32
    %485 = vector.broadcast %cst_108 : f32 to vector<2x32xf32>
    %486 = arith.addf %485, %484 : vector<2x32xf32>
    %487 = arith.divf %485, %486 : vector<2x32xf32>
    %488 = vector.extract_strided_slice %475 {offsets = [0, 32], sizes = [2, 32], strides = [1, 1]} : vector<2x96xf32> to vector<2x32xf32>
    %489 = vector.extract_strided_slice %479 {offsets = [0, 32], sizes = [2, 32], strides = [1, 1]} : vector<2x96xf32> to vector<2x32xf32>
    %490 = arith.addf %488, %489 : vector<2x32xf32>
    %491 = arith.negf %490 : vector<2x32xf32>
    %492 = math.exp %491 : vector<2x32xf32>
    %cst_109 = arith.constant 1.000000e+00 : f32
    %493 = vector.broadcast %cst_109 : f32 to vector<2x32xf32>
    %494 = arith.addf %493, %492 : vector<2x32xf32>
    %495 = arith.divf %493, %494 : vector<2x32xf32>
    %496 = vector.extract_strided_slice %475 {offsets = [0, 64], sizes = [2, 32], strides = [1, 1]} : vector<2x96xf32> to vector<2x32xf32>
    %497 = vector.extract_strided_slice %479 {offsets = [0, 64], sizes = [2, 32], strides = [1, 1]} : vector<2x96xf32> to vector<2x32xf32>
    %498 = arith.mulf %487, %497 : vector<2x32xf32>
    %499 = arith.addf %496, %498 : vector<2x32xf32>
    %500 = math.tanh %499 : vector<2x32xf32>
    %cst_110 = arith.constant 1.000000e+00 : f32
    %501 = vector.broadcast %cst_110 : f32 to vector<2x32xf32>
    %502 = arith.subf %501, %495 : vector<2x32xf32>
    %503 = arith.mulf %502, %500 : vector<2x32xf32>
    %504 = arith.mulf %495, %439 : vector<2x32xf32>
    %505 = arith.addf %503, %504 : vector<2x32xf32>
    %cst_111 = arith.constant dense<0.000000e+00> : vector<2x96xf32>
    %506 = tpu.matmul %468, %9, %cst_111 {dimension_numbers = #tpu.dot_dimension_numbers<[1], [0], [0], [1], [0, 0, 1, 1], [], []>} : vector<2x32xf32>, vector<32x96xf32>, vector<2x96xf32> -> vector<2x96xf32>
    %507 = vector.broadcast %10 : vector<1x96xf32> to vector<2x96xf32>
    %508 = arith.addf %506, %507 : vector<2x96xf32>
    %509 = vector.extract_strided_slice %476 {offsets = [0, 0], sizes = [2, 32], strides = [1, 1]} : vector<2x96xf32> to vector<2x32xf32>
    %510 = vector.extract_strided_slice %508 {offsets = [0, 0], sizes = [2, 32], strides = [1, 1]} : vector<2x96xf32> to vector<2x32xf32>
    %511 = arith.addf %509, %510 : vector<2x32xf32>
    %512 = arith.negf %511 : vector<2x32xf32>
    %513 = math.exp %512 : vector<2x32xf32>
    %cst_112 = arith.constant 1.000000e+00 : f32
    %514 = vector.broadcast %cst_112 : f32 to vector<2x32xf32>
    %515 = arith.addf %514, %513 : vector<2x32xf32>
    %516 = arith.divf %514, %515 : vector<2x32xf32>
    %517 = vector.extract_strided_slice %476 {offsets = [0, 32], sizes = [2, 32], strides = [1, 1]} : vector<2x96xf32> to vector<2x32xf32>
    %518 = vector.extract_strided_slice %508 {offsets = [0, 32], sizes = [2, 32], strides = [1, 1]} : vector<2x96xf32> to vector<2x32xf32>
    %519 = arith.addf %517, %518 : vector<2x32xf32>
    %520 = arith.negf %519 : vector<2x32xf32>
    %521 = math.exp %520 : vector<2x32xf32>
    %cst_113 = arith.constant 1.000000e+00 : f32
    %522 = vector.broadcast %cst_113 : f32 to vector<2x32xf32>
    %523 = arith.addf %522, %521 : vector<2x32xf32>
    %524 = arith.divf %522, %523 : vector<2x32xf32>
    %525 = vector.extract_strided_slice %476 {offsets = [0, 64], sizes = [2, 32], strides = [1, 1]} : vector<2x96xf32> to vector<2x32xf32>
    %526 = vector.extract_strided_slice %508 {offsets = [0, 64], sizes = [2, 32], strides = [1, 1]} : vector<2x96xf32> to vector<2x32xf32>
    %527 = arith.mulf %516, %526 : vector<2x32xf32>
    %528 = arith.addf %525, %527 : vector<2x32xf32>
    %529 = math.tanh %528 : vector<2x32xf32>
    %cst_114 = arith.constant 1.000000e+00 : f32
    %530 = vector.broadcast %cst_114 : f32 to vector<2x32xf32>
    %531 = arith.subf %530, %524 : vector<2x32xf32>
    %532 = arith.mulf %531, %529 : vector<2x32xf32>
    %533 = arith.mulf %524, %468 : vector<2x32xf32>
    %534 = arith.addf %532, %533 : vector<2x32xf32>
    %c7_115 = arith.constant 7 : index
    %c0_116 = arith.constant 0 : index
    %c0_117 = arith.constant 0 : index
    %535 = vector.load %arg9[%c7_115, %c0_116, %c0_117] : memref<8x2x32xf32, #tpu.memory_space<vmem>>, vector<1x2x32xf32>
    %536 = vector.shape_cast %535 : vector<1x2x32xf32> to vector<2x32xf32>
    %537 = vector.shape_cast %505 : vector<2x32xf32> to vector<1x2x32xf32>
    tpu.vector_store %arg9[%c7_115, %c0_116, %c0_117], %537 {strides = array<i32>} : memref<8x2x32xf32, #tpu.memory_space<vmem>>, vector<1x2x32xf32>,
    %c0_118 = arith.constant 0 : index
    %c0_119 = arith.constant 0 : index
    %c0_120 = arith.constant 0 : index
    %538 = vector.load %arg10[%c0_118, %c0_119, %c0_120] : memref<8x2x32xf32, #tpu.memory_space<vmem>>, vector<1x2x32xf32>
    %539 = vector.shape_cast %538 : vector<1x2x32xf32> to vector<2x32xf32>
    %540 = vector.shape_cast %534 : vector<2x32xf32> to vector<1x2x32xf32>
    tpu.vector_store %arg10[%c0_118, %c0_119, %c0_120], %540 {strides = array<i32>} : memref<8x2x32xf32, #tpu.memory_space<vmem>>, vector<1x2x32xf32>,
    %541 = tpu.concatenate %505, %72 in 1 : vector<2x32xf32>, vector<2x32xf32> -> vector<2x64xf32>
    %c0_121 = arith.constant 0 : index
    %c0_122 = arith.constant 0 : index
    %542 = vector.load %arg7[%c0_121, %c0_122] : memref<64x32xf32, #tpu.memory_space<vmem>>, vector<64x32xf32>
    %cst_123 = arith.constant dense<0.000000e+00> : vector<2x32xf32>
    %543 = tpu.matmul %541, %542, %cst_123 {dimension_numbers = #tpu.dot_dimension_numbers<[1], [0], [0], [1], [0, 0, 1, 1], [], []>} : vector<2x64xf32>, vector<64x32xf32>, vector<2x32xf32> -> vector<2x32xf32>
    %c0_124 = arith.constant 0 : index
    %c0_125 = arith.constant 0 : index
    %544 = vector.load %arg8[%c0_124, %c0_125] : memref<1x32xf32, #tpu.memory_space<vmem>>, vector<1x32xf32>
    %545 = vector.broadcast %544 : vector<1x32xf32> to vector<2x32xf32>
    %546 = arith.addf %543, %545 : vector<2x32xf32>
    %c0_126 = arith.constant 0 : index
    %c0_127 = arith.constant 0 : index
    %547 = vector.load %arg11[%c0_126, %c0_127] : memref<2x32xf32, #tpu.memory_space<vmem>>, vector<2x32xf32>
    tpu.vector_store %arg11[%c0_126, %c0_127], %546 {strides = array<i32>} : memref<2x32xf32, #tpu.memory_space<vmem>>, vector<2x32xf32>,
    return
  }
}

</mosaic_0001>

<bundles_post_ra>
// kernel: tpu_custom_call.1
= control target key start
LH: loop header
LB: loop body
LE: loop exit
PB: predicated region body
PF: predicated region fallthrough
CT: control target
= control target key end

     0   :  { %17 = vsyncpa [#allocation3], 0  ;;  %s3475_s0 = inlined_call_operand.hbm [shape: f32[8,2,32], index: 0, kind: input, shape index: {}]   ;;  %s3476_s1 = inlined_call_operand.vmem [shape: f32[32,192], index: 1, kind: input, shape index: {}]   ;;  %s3477_s2 = inlined_call_operand.vmem [shape: f32[1,192], index: 2, kind: input, shape index: {}]   ;;  %s3478_s3 = inlined_call_operand.vmem [shape: f32[32,96], index: 3, kind: input, shape index: {}]   ;;  %s3479_s4 = inlined_call_operand.vmem [shape: f32[1,96], index: 4, kind: input, shape index: {}]   ;;  %s3480_s5 = inlined_call_operand.hbm [shape: f32[32,96], index: 5, kind: input, shape index: {}]   ;;  %s3481_s6 = inlined_call_operand.vmem [shape: f32[1,96], index: 6, kind: input, shape index: {}]   ;;  %s3482_s7 = inlined_call_operand.vmem [shape: f32[64,32], index: 7, kind: input, shape index: {}]   ;;  %s3483_s8 = inlined_call_operand.vmem [shape: f32[1,32], index: 8, kind: input, shape index: {}]   ;;  %s3484_s9 = inlined_call_operand.hbm [shape: f32[8,2,32], index: 9, kind: output, shape index: {0}]   ;;  %s3485_s10 = inlined_call_operand.hbm [shape: f32[8,2,32], index: 10, kind: output, shape index: {1}]   ;;  %s3486_s11 = inlined_call_operand.hbm [shape: f32[2,32], index: 11, kind: output, shape index: {2}]  }
   0x1   :  { %18 = vsyncpa [#allocation6], 0 }
   0x2   :  { %19 = vsyncpa [#allocation4], 0 }
   0x3   :  { %20 = vsyncpa [#allocation9], 0  ;;  %s2872_s17 = smov [#allocation2]   ;;  %s2754_s21 = scalar_lea.hbm %s3475_s0, 256 }
   0x4   :  { %s26_s18 = sshll.u32 %s2872_s17, 4  ;;  %p2755_p0 = scmp.ne.s32.totalorder %s3475_s0, %s2754_s21  ;;  %s27_s18 = int_to_ptr.vmem [resolvable:$true] %s26_s18 }
   0x5   :  { %p2758_p1 = scmp.lt.u32.totalorder %s2754_s21, %s3475_s0 }
   0x7   :  { %p2760_p2 = pnand %p2758_p1, %p2755_p0 }
   0x9   :  { %2763 = shalt.err (!%p2760_p2)
}
   0xa   :  { %s2764_s26 = scalar_lea.vmem %s27_s18, 256  ;;  %p2769_p4 = scmp.lt.s32.totalorder %s27_s18, %s27_s18 }
   0xb   :  { %p2765_p3 = scmp.ne.s32.totalorder %s27_s18, %s2764_s26  ;;  %p2770_p5 = scmp.lt.s32.totalorder %s2764_s26, %s2764_s26 }
   0xd   :  { %p2771_p6 = por %p2770_p5, %p2769_p4 }
   0xf   :  { %p2772_p7 = pnand %p2771_p6, %p2765_p3 }
  0x11   :  { %2775 = shalt.err (!%p2772_p7)
}
  0x12   :  { %s2873_s27 = smov 32   ;;  %s2874_s28 = smov 2  }
  0x13   :  { %32 = dma.hbm_to_vmem [thread:$0]  %s3475_s0, 256, %s27_s18, [#allocation3], %s2873_s27, %s2873_s27, %s2874_s28  }
  0x14   :  { %s2875_s12 = smov [#allocation5]   ;;  %s2776_s16 = scalar_lea.hbm %s3480_s5, 512 }
  0x15   :  { %s46_s13 = sshll.u32 %s2875_s12, 4  ;;  %p2777_p8 = scmp.ne.s32.totalorder %s3480_s5, %s2776_s16  ;;  %s47_s13 = int_to_ptr.vmem [resolvable:$true] %s46_s13 }
  0x16   :  { %p2780_p9 = scmp.lt.u32.totalorder %s2776_s16, %s3480_s5 }
  0x18   :  { %p2782_p10 = pnand %p2780_p9, %p2777_p8 }
  0x1a   :  { %2785 = shalt.err (!%p2782_p10)
}
  0x1b   :  { %s2786_s22 = scalar_lea.vmem %s47_s13, 512  ;;  %p2791_p12 = scmp.lt.s32.totalorder %s47_s13, %s47_s13 }
  0x1c   :  { %p2787_p11 = scmp.ne.s32.totalorder %s47_s13, %s2786_s22  ;;  %p2792_p13 = scmp.lt.s32.totalorder %s2786_s22, %s2786_s22 }
  0x1e   :  { %p2793_p0 = por %p2792_p13, %p2791_p12 }
  0x20   :  { %p2794_p1 = pnand %p2793_p0, %p2787_p11 }
  0x22   :  { %2797 = shalt.err (!%p2794_p1)
}
  0x23   :  { %s2876_s0 = smov 128   ;;  %s2877_s18 = smov 8  }
  0x24   :  { %52 = dma.hbm_to_vmem [thread:$0]  %s3480_s5, 512, %s47_s13, [#allocation6], %s2876_s0, %s2876_s0, %s2877_s18  }
  0x25   :  { %2864 = dma.done.wait [#allocation3], 256  }
  0x26   :  { %2865 = vsyncadd [#allocation3], 4294967040 }
  0x27   :  { %2866 = dma.done.wait [#allocation6], 512  }
  0x28   :  { %2867 = vsyncadd [#allocation6], 4294966784  ;;  %v2878_v0 = vmov 0.0|0.0   ;;  %vm2879_vm0 = vmmov 0   ;;  %v2880_v1 = vmov 0.0   ;;  %v83_v2 = vlaneseq  ;;  %v74_v7 = vld [vmem:[%s3476_s1 + $0x8] sm:$0xff] }
  0x29   :  { %2501 = vmatprep.subr.bf16.mxu1 %v2878_v0  ;;  %2306 = vmatprep.mubr.msk.f32.mxu1 %vm2879_vm0, %v2880_v1  ;;  %v2881_v3 = vmov 1983009808   ;;  %v76_v8 = vld [vmem:[%s3476_s1 + $0x18] sm:$0xff]  ;;  %v217_v9 = vld [vmem:[%s3478_s3] sm:$0xff]  ;;  %v218_v11 = vld [vmem:[%s3478_s3 + $0x8] sm:$0xff]  ;;  %vm135_vm1 = vcmask 261120  }
  0x2a   :  { %204 = vmatprep.mubr.f32.mxu0 %v2880_v1  ;;  %v104_v4 = vunpack.c.l.s4 %v2881_v3  ;;  %v2978_v5 = vshrl.u32 %v83_v2, 7  ;;  %v2493_v10 = vpack.c.bf16 %v76_v8, %v74_v7  ;;  %v73_v12 = vld [vmem:[%s3476_s1] sm:$0xff]  ;;  %v75_v13 = vld [vmem:[%s3476_s1 + $0x10] sm:$0xff]  ;;  %v2998_v14 = vpack.c.bf16 %v218_v11, %v217_v9  ;;  %v78_v16 = vld [vmem:[%s3476_s1 + $0x28] sm:$0xff]  ;;  %s2882_s14 = smov 64   ;;  %s2883_s16 = smov 96  }
  0x2b   :  { %v2495_v15 = vpack.c.bf16 %v75_v13, %v73_v12  ;;  %v80_v17 = vld [vmem:[%s3476_s1 + $0x38] sm:$0xff]  ;;  %v219_v18 = vld [vmem:[%s3478_s3 + $0x10] sm:$0xff]  ;;  %v77_v21 = vld [vmem:[%s3476_s1 + $0x20] sm:$0xff]  ;;  %vm449_vm2 = vcmask 254976   ;;  %vm452_vm3 = vcmask 261126   ;;  %vm677_vm4 = vcmask 259076  }
  0x2c   :  { %v105_v6 = vunpack.c.0.s8 %v104_v4  ;;  %2494 = vmatprep.subr.bf16.mxu0 %v2493_v10  ;;  %v2497_v19 = vpack.c.bf16 %v80_v17, %v78_v16  ;;  %v220_v20 = vld [vmem:[%s3478_s3 + $0x18] sm:$0xff]  ;;  %v79_v22 = vld [vmem:[%s3476_s1 + $0x30] sm:$0xff]  ;;  %2503 = vmatpush3.bf16.msra.mxu1 %v2998_v14  ;;  %v65_v26 = vld [vmem:[#allocation2] sm:$0x3]  ;;  %v89_v50 = vsub.s32 1, %v2978_v5  ;;  %v85_v55 = vsub.s32 0, %v2978_v5 }
  0x2d   :  { %2496 = vmatpush1.bf16.msra.mxu0 %v2495_v15  ;;  %v3020_v24 = vpack.c.bf16 %v220_v20, %v219_v18  ;;  %v2499_v25 = vpack.c.bf16 %v79_v22, %v77_v21  ;;  %v66_v27 = vld [vmem:[#allocation2 + $0x2] sm:$0x3]  ;;  %v67_v28 = vld [vmem:[#allocation2 + $0x4] sm:$0x3]  ;;  %2504 = vmatprep.subr.bf16.mxu1 %v2878_v0  ;;  %v68_v29 = vld [vmem:[#allocation2 + $0x6] sm:$0x3] }
  0x2e   :  { %v108_v23 = vsub.s32 %v105_v6, %v2978_v5  ;;  %2498 = vmatprep.subr.bf16.mxu0 %v2497_v19  ;;  %v101_v30 = vcombine.low %v65_v26, %v66_v27  ;;  %v222_v31 = vld [vmem:[#allocation5] sm:$0xff]  ;;  %v223_v32 = vld [vmem:[#allocation5 + $0x8] sm:$0xff]  ;;  %v102_v33 = vcombine.low %v67_v28, %v68_v29  ;;  %v69_v34 = vld [vmem:[#allocation2 + $0x8] sm:$0x3]  ;;  %vm674_vm5 = vcmask 257026   ;;  %s2886_s17 = smov [#allocation7]  }
  0x2f   :  { %v70_v35 = vld [vmem:[#allocation2 + $0xa] sm:$0x3]  ;;  %v71_v36 = vld [vmem:[#allocation2 + $0xc] sm:$0x3]  ;;  %v72_v38 = vld [vmem:[#allocation2 + $0xe] sm:$0x3]  ;;  %v3025_v42 = vpack.c.bf16 %v223_v32, %v222_v31 }
  0x30   :  { %v109_v37 = vrot.slane %v101_v30, %v108_v23  ;;  %v118_v39 = vcombine.low %v69_v34, %v70_v35  ;;  %2506 = vmatpush3.bf16.msra.mxu1 %v3020_v24  ;;  %v116_v40 = vrot.slane %v102_v33, %v108_v23  ;;  %v119_v41 = vcombine.low %v71_v36, %v72_v38  ;;  %v224_v46 = vld [vmem:[#allocation5 + $0x10] sm:$0xff]  ;;  %v225_v47 = vld [vmem:[#allocation5 + $0x18] sm:$0xff]  ;;  %s2123_s19 = sshll.u32 %s2886_s17, 4  ;;  %s3420_s19 = int_to_ptr.vmem [resolvable:$true] %s2123_s19 }
  0x31   :  { %2500 = vmatpush1.bf16.msra.mxu0 %v2499_v25  ;;  %2513 = vmatprep.subr.bf16.mxu1 %v2878_v0  ;;  %v3033_v49 = vpack.c.bf16 %v225_v47, %v224_v46  ;;  %v3057_v51 = vld [vmem:[%s3479_s4] ss:$0 sm:$0xff]  ;;  %vm2044_vm6 = vcmask 523264  }
  0x32   :  { %2507 = vmatprep.subr.bf16.mxu0 %v2878_v0  ;;  %v126_v43 = vrot.slane %v118_v39, %v108_v23  ;;  %v117_v44 = vcombine.low %v109_v37, %v116_v40  ;;  %v133_v45 = vrot.slane %v119_v41, %v108_v23  ;;  %v81_v52 = vld [vmem:[%s3477_s2] sm:$0x3] }
  0x33   :  { %2307 = vmatmul.mubr.f32.vlgmr.msra.gmra.mrb[0].mxu1 %v2880_v1  ;;  %v90_v53 = vrot.slane %v81_v52, %v89_v50  ;;  %v86_v61 = vrot.slane %v81_v52, %v85_v55  ;;  %v3077_v11 = vld [vmem:[%s3481_s6] ss:$0 sm:$0xff] }
  0x34   :  { %2165 = vmatmul.mubr.msk.f32.vlgmr.msra.gmra.mrb[0].mxu0 %vm135_vm1, %v117_v44  ;;  %v134_v48 = vcombine.low %v126_v43, %v133_v45  ;;  %2515 = vmatpush3.bf16.msra.mxu1 %v2998_v14 }
  0x35   :  { %2509 = vmatpush3.bf16.msra.mxu0 %v3025_v42  ;;  %210 = vmatprep.mubr.f32.mxu0 %v2880_v1 }
  0x36   :  { %2510 = vmatprep.subr.bf16.mxu0 %v2878_v0  ;;  %2516 = vmatprep.subr.bf16.mxu1 %v2878_v0 }
  0x37   :  { %2328 = vmatprep.mubr.msk.f32.mxu1 %vm2879_vm0, %v2880_v1 }
  0x38   :  { %2166 = vmatmul.mubr.msk.f32.gmra.mrb[2].mxu0 %vm135_vm1, %v134_v48  ;;  %2518 = vmatpush3.bf16.msra.mxu1 %v3020_v24 }
  0x39   :  { %2512 = vmatpush3.bf16.msra.mxu0 %v3033_v49  ;;  %2317 = vmatprep.mubr.msk.f32.mxu0 %vm2879_vm0, %v2880_v1 }
  0x3a   :  { %2519 = vmatprep.subr.bf16.mxu0 %v2878_v0  ;;  %2525 = vmatprep.subr.bf16.mxu1 %v2878_v0 }
  0x3c   :  { %2318 = vmatmul.mubr.f32.vlgmr.msra.gmra.mrb[4].mxu0 %v2880_v1 }
  0x3d   :  { %2521 = vmatpush3.bf16.msra.mxu0 %v3025_v42  ;;  %2339 = vmatprep.mubr.msk.f32.mxu0 %vm2879_vm0, %v2880_v1 }
  0x3e   :  { %2522 = vmatprep.subr.bf16.mxu0 %v2878_v0 }
  0x41   :  { %2524 = vmatpush3.bf16.msra.mxu0 %v3033_v49 }
  0x42   :  { %2531 = vmatprep.subr.bf16.mxu0 %v2878_v0 }
 0x106   :  { %v302_v54 = vpop.f32.mrb[0].mxu1 }
 0x107   :  { %v303_v56 = vadd.f32 %v3057_v51, %v302_v54  ;;  %v206_v57 = vpop.f32.mrb[0].mxu0  ;;  %v2308_v58 = vpop.f32.mrb[1].mxu1 }
 0x108   :  { %v208_v59 = vpop.f32.mrb[1].mxu0  ;;  %v3071_v5 = vadd.f32 %v206_v57, %v86_v61 }
 0x109   :  { %314 = vrot.lane.b32.xlu0 %v303_v56, %s2882_s14  ;;  %v3065_v60 = vadd.f32 %v208_v59, %v90_v53 }
 0x10a   :  { %v306_v7 = vadd.f32 %v303_v56, %v3071_v5 }
 0x10b   :  { %v212_v62 = vpop.f32.mrb[2].mxu0 }
 0x10c   :  { %v3067_v63 = vadd.f32 %v212_v62, %v86_v61  ;;  %v214_v2 = vpop.f32.mrb[3].mxu0  ;;  %v2168_v8 = vmul.f32 -1.442695, %v306_v7 }
 0x10d   :  { %v3069_v3 = vadd.f32 %v214_v2, %v90_v53 }
 0x10e   :  { %2624 = vpow2.f32 %v2168_v8 }
 0x10f   :  { %v404_v4 = vpop.f32.mrb[4].mxu0 }
 0x110   :  { %v2319_v6 = vpop.f32.mrb[5].mxu0  ;;  %v405_v12 = vadd.f32 %v3077_v11, %v404_v4 }
 0x112   :  { %v409_v17 = vrot.slane %v405_v12, 2 }
 0x118   :  { %v2625_v9 = vpop.eup %2624 }
 0x119   :  { %v310_v10 = vadd.f32 1.0, %v2625_v9 }
 0x11b   :  { %2626 = vrcp.f32 %v310_v10 }
 0x125   :  { %v2627_v13 = vpop.eup %2626 }
 0x126   :  { %v324_v30 = vsub.f32 1.0, %v2627_v13  ;;  %v330_v32 = vmul.f32 0.0, %v2627_v13 }
 0x17b   :  { %v315_v15 = vpop.permute.xlu0 %314 }
 0x17c   :  { %v317_v16 = vmul.f32 %v2627_v13, %v315_v15 }
 0x17e   :  { %319 = vrot.lane.b32.xlu0 %v317_v16, %s2882_s14 }
 0x182   :  { %410 = vrot.lane.b32.xlu0 %v409_v17, %s2883_s16 }
 0x186   :  { %427 = vrot.lane.b32.xlu0 %v409_v17, %s2873_s27 }
 0x1f0   :  { %v320_v18 = vpop.permute.xlu0 %319 }
 0x1f1   :  { %v322_v19 = vadd.f32 %v320_v18, %v3071_v5 }
 0x1f3   :  { %2628 = vtanh.f32 %v322_v19 }
 0x1f4   :  { %v411_v20 = vpop.permute.xlu0 %410 }
 0x1f5   :  { %v413_v21 = vadd.f32 %v411_v20, %v3067_v63  ;;  %v420_v38 = vadd.f32 %v411_v20, %v3069_v3 }
 0x1f7   :  { %v2170_v22 = vmul.f32 -1.442695, %v413_v21  ;;  %v2171_v39 = vmul.f32 -1.442695, %v420_v38 }
 0x1f8   :  { %v428_v27 = vpop.permute.xlu0 %427 }
 0x1f9   :  { %2630 = vpow2.f32 %v2170_v22 }
 0x1fd   :  { %v2629_v23 = vpop.eup %2628 }
 0x1fe   :  { %326 = vrot.lane.b32.xlu1 %v2629_v23, %s2883_s16 }
 0x203   :  { %v2631_v25 = vpop.eup %2630 }
 0x204   :  { %v417_v26 = vadd.f32 1.0, %v2631_v25 }
 0x206   :  { %2632 = vrcp.f32 %v417_v26 }
 0x210   :  { %v2633_v28 = vpop.eup %2632 }
 0x211   :  { %v430_v29 = vmul.f32 %v2633_v28, %v428_v27 }
 0x213   :  { %432 = vrot.lane.b32.xlu0 %v430_v29, %s2882_s14 }
 0x270   :  { %v327_v31 = vpop.permute.xlu1 %326 }
 0x271   :  { %v329_v33 = vmul.f32 %v327_v31, %v324_v30 }
 0x273   :  { %v3087_v34 = vadd.f32 %v330_v32, %v329_v33 }
 0x275   :  { %446 = vrot.lane.b32.xlu1 %v3087_v34, %s2883_s16  ;;  %v552_v15 = vrot.slane %v3087_v34, 6 }
 0x285   :  { %v433_v35 = vpop.permute.xlu0 %432 }
 0x286   :  { %v435_v36 = vadd.f32 %v433_v35, %v3069_v3 }
 0x288   :  { %2634 = vtanh.f32 %v435_v36 }
 0x289   :  { %2636 = vpow2.f32 %v2171_v39 }
 0x292   :  { %v2635_v37 = vpop.eup %2634 }
 0x293   :  { %439 = vrot.lane.b32.xlu0 %v2635_v37, %s2883_s16  ;;  %v2637_v41 = vpop.eup %2636 }
 0x294   :  { %v424_v43 = vadd.f32 1.0, %v2637_v41 }
 0x296   :  { %2638 = vrcp.f32 %v424_v43 }
 0x2a0   :  { %v2639_v44 = vpop.eup %2638 }
 0x2a1   :  { %v437_v45 = vsub.f32 1.0, %v2639_v44  ;;  %v443_v46 = vmul.f32 0.0, %v2639_v44 }
 0x2e7   :  { %v447_v40 = vpop.permute.xlu1 %446 }
 0x2e8   :  { %450 = vst.msk [vmem:[#allocation7] sm:$0x3] %vm449_vm2, %v447_v40  ;;  %2329 = vmatmul.mubr.msk.f32.vlgmr.msra.gmra.mrb[2].mxu1 %vm135_vm1, %v447_v40 }
 0x2e9   :  { %2527 = vmatpush3.bf16.msra.mxu1 %v2998_v14  ;;  %2350 = vmatprep.mubr.msk.f32.mxu1 %vm2879_vm0, %v2880_v1 }
 0x2ea   :  { %2528 = vmatprep.subr.bf16.mxu1 %v2878_v0 }
 0x2ed   :  { %2530 = vmatpush3.bf16.msra.mxu1 %v3020_v24 }
 0x2ee   :  { %2537 = vmatprep.subr.bf16.mxu1 %v2878_v0 }
 0x305   :  { %v440_v47 = vpop.permute.xlu0 %439 }
 0x306   :  { %v442_v48 = vmul.f32 %v440_v47, %v437_v45 }
 0x308   :  { %v3102_v50 = vadd.f32 %v443_v46, %v442_v48 }
 0x30a   :  { %v557_v52 = vrot.slane %v3102_v50, 6  ;;  %453 = vst.msk [vmem:[#allocation8 + $0x8] sm:$0xc0] %vm452_vm3, %v3102_v50  ;;  %v665_v46 = vrot.slane %v3102_v50, 2 }
 0x30c   :  { %2340 = vmatmul.mubr.msk.f32.vlgmr.msra.gmra.mrb[6].mxu0 %vm135_vm1, %v557_v52 }
 0x30d   :  { %2533 = vmatpush3.bf16.msra.mxu0 %v3025_v42  ;;  %2361 = vmatprep.mubr.msk.f32.mxu0 %vm2879_vm0, %v2880_v1 }
 0x30e   :  { %2534 = vmatprep.subr.bf16.mxu0 %v2878_v0 }
 0x311   :  { %2536 = vmatpush3.bf16.msra.mxu0 %v3033_v49 }
 0x312   :  { %2543 = vmatprep.subr.bf16.mxu0 %v2878_v0 }
 0x3bb   :  { %v522_v53 = vpop.f32.mrb[2].mxu1 }
 0x3bc   :  { %v523_v54 = vadd.f32 %v3057_v51, %v522_v53  ;;  %v2330_v55 = vpop.f32.mrb[3].mxu1 }
 0x3be   :  { %v527_v56 = vrot.slane %v523_v54, 6 }
 0x3c0   :  { %536 = vrot.lane.b32.xlu1 %v527_v56, %s2882_s14  ;;  %v529_v62 = vadd.f32 %v527_v56, %v3071_v5 }
 0x3c2   :  { %v2173_v2 = vmul.f32 -1.442695, %v529_v62 }
 0x3c4   :  { %2640 = vpow2.f32 %v2173_v2 }
 0x3ce   :  { %v2641_v4 = vpop.eup %2640 }
 0x3cf   :  { %v533_v6 = vadd.f32 1.0, %v2641_v4 }
 0x3d1   :  { %2642 = vrcp.f32 %v533_v6 }
 0x3db   :  { %v2643_v7 = vpop.eup %2642 }
 0x3dc   :  { %v546_v16 = vsub.f32 1.0, %v2643_v7  ;;  %v554_v19 = vmul.f32 %v2643_v7, %v552_v15 }
 0x3df   :  { %v626_v57 = vpop.f32.mrb[6].mxu0 }
 0x3e0   :  { %v627_v58 = vadd.f32 %v3077_v11, %v626_v57  ;;  %v2341_v59 = vpop.f32.mrb[7].mxu0 }
 0x3e2   :  { %v631_v61 = vrot.slane %v627_v58, 4 }
 0x3e4   :  { %632 = vrot.lane.b32.xlu0 %v631_v61, %s2883_s16 }
 0x432   :  { %v537_v8 = vpop.permute.xlu1 %536 }
 0x433   :  { %v539_v9 = vmul.f32 %v2643_v7, %v537_v8 }
 0x435   :  { %541 = vrot.lane.b32.xlu1 %v539_v9, %s2882_s14 }
 0x456   :  { %v633_v22 = vpop.permute.xlu0 %632 }
 0x457   :  { %v635_v23 = vadd.f32 %v633_v22, %v3067_v63  ;;  %v642_v35 = vadd.f32 %v633_v22, %v3069_v3 }
 0x459   :  { %v2175_v25 = vmul.f32 -1.442695, %v635_v23  ;;  %v2176_v39 = vmul.f32 -1.442695, %v642_v35 }
 0x4a7   :  { %v542_v10 = vpop.permute.xlu1 %541 }
 0x4a8   :  { %v544_v12 = vadd.f32 %v542_v10, %v3071_v5 }
 0x4aa   :  { %2644 = vtanh.f32 %v544_v12 }
 0x4ab   :  { %2646 = vpow2.f32 %v2175_v25 }
 0x4b4   :  { %v2645_v13 = vpop.eup %2644 }
 0x4b5   :  { %548 = vrot.lane.b32.xlu1 %v2645_v13, %s2883_s16  ;;  %v2647_v26 = vpop.eup %2646 }
 0x4b6   :  { %v639_v27 = vadd.f32 1.0, %v2647_v26 }
 0x4b8   :  { %2648 = vrcp.f32 %v639_v27 }
 0x4c2   :  { %v2649_v29 = vpop.eup %2648 }
 0x527   :  { %v549_v17 = vpop.permute.xlu1 %548 }
 0x528   :  { %v551_v18 = vmul.f32 %v549_v17, %v546_v16 }
 0x52a   :  { %v3123_v20 = vadd.f32 %v554_v19, %v551_v18 }
 0x52c   :  { %v679_v21 = vrot.slane %v3123_v20, 2  ;;  %v780_v13 = vrot.slane %v3123_v20, 6 }
 0x52e   :  { %680 = vrot.lane.b32.xlu1 %v679_v21, %s2883_s16 }
 0x532   :  { %649 = vrot.lane.b32.xlu1 %v631_v61, %s2873_s27 }
 0x5a0   :  { %v681_v28 = vpop.permute.xlu1 %680 }
 0x5a1   :  { %2351 = vmatmul.mubr.msk.f32.vlgmr.msra.gmra.mrb[4].mxu1 %vm135_vm1, %v681_v28 }
 0x5a2   :  { %2539 = vmatpush3.bf16.msra.mxu1 %v2998_v14  ;;  %2372 = vmatprep.mubr.msk.f32.mxu1 %vm2879_vm0, %v2880_v1 }
 0x5a3   :  { %2540 = vmatprep.subr.bf16.mxu1 %v2878_v0 }
 0x5a4   :  { %v650_v30 = vpop.permute.xlu1 %649 }
 0x5a5   :  { %v652_v31 = vmul.f32 %v2649_v29, %v650_v30 }
 0x5a6   :  { %2542 = vmatpush3.bf16.msra.mxu1 %v3020_v24 }
 0x5a7   :  { %654 = vrot.lane.b32.xlu1 %v652_v31, %s2882_s14  ;;  %2549 = vmatprep.subr.bf16.mxu1 %v2878_v0 }
 0x619   :  { %v655_v32 = vpop.permute.xlu1 %654 }
 0x61a   :  { %v657_v33 = vadd.f32 %v655_v32, %v3069_v3 }
 0x61c   :  { %2650 = vtanh.f32 %v657_v33 }
 0x61d   :  { %2652 = vpow2.f32 %v2176_v39 }
 0x626   :  { %v2651_v34 = vpop.eup %2650 }
 0x627   :  { %661 = vrot.lane.b32.xlu1 %v2651_v34, %s2883_s16  ;;  %v2653_v41 = vpop.eup %2652 }
 0x628   :  { %v646_v43 = vadd.f32 1.0, %v2653_v41 }
 0x62a   :  { %2654 = vrcp.f32 %v646_v43 }
 0x634   :  { %v2655_v44 = vpop.eup %2654 }
 0x635   :  { %v659_v45 = vsub.f32 1.0, %v2655_v44  ;;  %v667_v48 = vmul.f32 %v2655_v44, %v665_v46 }
 0x674   :  { %v750_v36 = vpop.f32.mrb[4].mxu1 }
 0x675   :  { %v751_v37 = vadd.f32 %v3057_v51, %v750_v36  ;;  %v2352_v38 = vpop.f32.mrb[5].mxu1 }
 0x677   :  { %v755_v40 = vrot.slane %v751_v37, 4 }
 0x679   :  { %764 = vrot.lane.b32.xlu0 %v755_v40, %s2882_s14  ;;  %v757_v55 = vadd.f32 %v755_v40, %v3071_v5 }
 0x67b   :  { %v2178_v56 = vmul.f32 -1.442695, %v757_v55 }
 0x67d   :  { %2656 = vpow2.f32 %v2178_v56 }
 0x687   :  { %v2657_v57 = vpop.eup %2656 }
 0x688   :  { %v761_v58 = vadd.f32 1.0, %v2657_v57 }
 0x68a   :  { %2658 = vrcp.f32 %v761_v58 }
 0x694   :  { %v2659_v59 = vpop.eup %2658 }
 0x695   :  { %v774_v12 = vsub.f32 1.0, %v2659_v59  ;;  %v782_v16 = vmul.f32 %v2659_v59, %v780_v13 }
 0x699   :  { %v662_v47 = vpop.permute.xlu1 %661 }
 0x69a   :  { %v664_v52 = vmul.f32 %v662_v47, %v659_v45 }
 0x69c   :  { %v3143_v53 = vadd.f32 %v667_v48, %v664_v52 }
 0x69e   :  { %v785_v54 = vrot.slane %v3143_v53, 4  ;;  %678 = vst.msk [vmem:[#allocation8 + $0x8] sm:$0x30] %vm677_vm4, %v3143_v53  ;;  %v893_v45 = vrot.slane %v3143_v53, 2 }
 0x6a0   :  { %2362 = vmatmul.mubr.msk.f32.vlgmr.msra.gmra.mrb[8].mxu0 %vm135_vm1, %v785_v54 }
 0x6a1   :  { %2545 = vmatpush3.bf16.msra.mxu0 %v3025_v42  ;;  %2383 = vmatprep.mubr.msk.f32.mxu0 %vm2879_vm0, %v2880_v1 }
 0x6a2   :  { %2546 = vmatprep.subr.bf16.mxu0 %v2878_v0 }
 0x6a5   :  { %2548 = vmatpush3.bf16.msra.mxu0 %v3033_v49 }
 0x6a6   :  { %2555 = vmatprep.subr.bf16.mxu0 %v2878_v0 }
 0x6eb   :  { %v765_v61 = vpop.permute.xlu0 %764 }
 0x6ec   :  { %v767_v62 = vmul.f32 %v2659_v59, %v765_v61 }
 0x6ee   :  { %769 = vrot.lane.b32.xlu0 %v767_v62, %s2882_s14 }
 0x760   :  { %v770_v2 = vpop.permute.xlu0 %769 }
 0x761   :  { %v772_v4 = vadd.f32 %v770_v2, %v3071_v5 }
 0x763   :  { %2660 = vtanh.f32 %v772_v4 }
 0x76d   :  { %v2661_v6 = vpop.eup %2660 }
 0x76e   :  { %776 = vrot.lane.b32.xlu0 %v2661_v6, %s2883_s16 }
 0x773   :  { %v854_v7 = vpop.f32.mrb[8].mxu0 }
 0x774   :  { %v855_v8 = vadd.f32 %v3077_v11, %v854_v7  ;;  %v2363_v9 = vpop.f32.mrb[9].mxu0 }
 0x776   :  { %v859_v10 = vrot.slane %v855_v8, 6 }
 0x778   :  { %860 = vrot.lane.b32.xlu0 %v859_v10, %s2883_s16 }
 0x7e0   :  { %v777_v15 = vpop.permute.xlu0 %776 }
 0x7e1   :  { %v779_v17 = vmul.f32 %v777_v15, %v774_v12 }
 0x7e3   :  { %v3162_v18 = vadd.f32 %v782_v16, %v779_v17 }
 0x7e5   :  { %v905_v19 = vrot.slane %v3162_v18, 4 }
 0x7e7   :  { %906 = vrot.lane.b32.xlu1 %v905_v19, %s2883_s16 }
 0x7ea   :  { %v861_v21 = vpop.permute.xlu0 %860 }
 0x7eb   :  { %877 = vrot.lane.b32.xlu1 %v859_v10, %s2873_s27  ;;  %v863_v22 = vadd.f32 %v861_v21, %v3067_v63  ;;  %v870_v34 = vadd.f32 %v861_v21, %v3069_v3  ;;  %v1006_v10 = vrot.slane %v3162_v18, 6 }
 0x7ed   :  { %v2180_v23 = vmul.f32 -1.442695, %v863_v22  ;;  %v2181_v38 = vmul.f32 -1.442695, %v870_v34 }
 0x7ef   :  { %2662 = vpow2.f32 %v2180_v23 }
 0x7f9   :  { %v2663_v25 = vpop.eup %2662 }
 0x7fa   :  { %v867_v26 = vadd.f32 1.0, %v2663_v25 }
 0x7fc   :  { %2664 = vrcp.f32 %v867_v26 }
 0x806   :  { %v2665_v28 = vpop.eup %2664 }
 0x859   :  { %v907_v27 = vpop.permute.xlu1 %906 }
 0x85a   :  { %2373 = vmatmul.mubr.msk.f32.vlgmr.msra.gmra.mrb[6].mxu1 %vm135_vm1, %v907_v27 }
 0x85b   :  { %2551 = vmatpush3.bf16.msra.mxu1 %v2998_v14  ;;  %2394 = vmatprep.mubr.msk.f32.mxu1 %vm2879_vm0, %v2880_v1 }
 0x85c   :  { %2552 = vmatprep.subr.bf16.mxu1 %v2878_v0 }
 0x85d   :  { %v878_v29 = vpop.permute.xlu1 %877 }
 0x85e   :  { %v880_v30 = vmul.f32 %v2665_v28, %v878_v29 }
 0x85f   :  { %2554 = vmatpush3.bf16.msra.mxu1 %v3020_v24 }
 0x860   :  { %882 = vrot.lane.b32.xlu1 %v880_v30, %s2882_s14  ;;  %2561 = vmatprep.subr.bf16.mxu1 %v2878_v0 }
 0x8d2   :  { %v883_v31 = vpop.permute.xlu1 %882 }
 0x8d3   :  { %v885_v32 = vadd.f32 %v883_v31, %v3069_v3 }
 0x8d5   :  { %2666 = vtanh.f32 %v885_v32 }
 0x8d6   :  { %2668 = vpow2.f32 %v2181_v38 }
 0x8df   :  { %v2667_v33 = vpop.eup %2666 }
 0x8e0   :  { %889 = vrot.lane.b32.xlu1 %v2667_v33, %s2883_s16  ;;  %v2669_v40 = vpop.eup %2668 }
 0x8e1   :  { %v874_v41 = vadd.f32 1.0, %v2669_v40 }
 0x8e3   :  { %2670 = vrcp.f32 %v874_v41 }
 0x8ed   :  { %v2671_v43 = vpop.eup %2670 }
 0x8ee   :  { %v887_v44 = vsub.f32 1.0, %v2671_v43  ;;  %v895_v47 = vmul.f32 %v2671_v43, %v893_v45 }
 0x92d   :  { %v976_v35 = vpop.f32.mrb[6].mxu1 }
 0x92e   :  { %v977_v36 = vadd.f32 %v3057_v51, %v976_v35  ;;  %v2374_v37 = vpop.f32.mrb[7].mxu1 }
 0x930   :  { %v981_v39 = vrot.slane %v977_v36, 2 }
 0x932   :  { %990 = vrot.lane.b32.xlu0 %v981_v39, %s2882_s14  ;;  %v983_v53 = vadd.f32 %v981_v39, %v3071_v5 }
 0x934   :  { %v2183_v55 = vmul.f32 -1.442695, %v983_v53 }
 0x936   :  { %2672 = vpow2.f32 %v2183_v55 }
 0x940   :  { %v2673_v56 = vpop.eup %2672 }
 0x941   :  { %v987_v57 = vadd.f32 1.0, %v2673_v56 }
 0x943   :  { %2674 = vrcp.f32 %v987_v57 }
 0x94d   :  { %v2675_v58 = vpop.eup %2674 }
 0x94e   :  { %v1000_v9 = vsub.f32 1.0, %v2675_v58  ;;  %v1008_v13 = vmul.f32 %v2675_v58, %v1006_v10 }
 0x952   :  { %v890_v46 = vpop.permute.xlu1 %889 }
 0x953   :  { %v892_v48 = vmul.f32 %v890_v46, %v887_v44 }
 0x955   :  { %v3182_v52 = vadd.f32 %v895_v47, %v892_v48 }
 0x957   :  { %v1011_v54 = vrot.slane %v3182_v52, 2  ;;  %904 = vst.msk [vmem:[#allocation8 + $0x8] sm:$0xc] %vm674_vm5, %v3182_v52 }
 0x959   :  { %2384 = vmatmul.mubr.msk.f32.vlgmr.msra.gmra.mrb[10].mxu0 %vm135_vm1, %v1011_v54 }
 0x95a   :  { %2557 = vmatpush3.bf16.msra.mxu0 %v3025_v42  ;;  %2405 = vmatprep.mubr.msk.f32.mxu0 %vm2879_vm0, %v2880_v1 }
 0x95b   :  { %2558 = vmatprep.subr.bf16.mxu0 %v2878_v0 }
 0x95e   :  { %2560 = vmatpush3.bf16.msra.mxu0 %v3033_v49 }
 0x95f   :  { %2567 = vmatprep.subr.bf16.mxu0 %v2878_v0 }
 0x9a4   :  { %v991_v59 = vpop.permute.xlu0 %990 }
 0x9a5   :  { %v993_v61 = vmul.f32 %v2675_v58, %v991_v59 }
 0x9a7   :  { %995 = vrot.lane.b32.xlu0 %v993_v61, %s2882_s14 }
 0xa19   :  { %v996_v62 = vpop.permute.xlu0 %995 }
 0xa1a   :  { %v998_v2 = vadd.f32 %v996_v62, %v3071_v5 }
 0xa1c   :  { %2676 = vtanh.f32 %v998_v2 }
 0xa26   :  { %v2677_v4 = vpop.eup %2676 }
 0xa27   :  { %1002 = vrot.lane.b32.xlu0 %v2677_v4, %s2883_s16 }
 0xa2c   :  { %v1080_v6 = vpop.f32.mrb[10].mxu0 }
 0xa2d   :  { %v1081_v7 = vadd.f32 %v3077_v11, %v1080_v6  ;;  %v2385_v8 = vpop.f32.mrb[11].mxu0 }
 0xa2f   :  { %1085 = vrot.lane.b32.xlu0 %v1081_v7, %s2883_s16 }
 0xa99   :  { %v1003_v12 = vpop.permute.xlu0 %1002 }
 0xa9a   :  { %v1005_v15 = vmul.f32 %v1003_v12, %v1000_v9 }
 0xa9c   :  { %v3203_v16 = vadd.f32 %v1008_v13, %v1005_v15 }
 0xa9e   :  { %v1129_v17 = vrot.slane %v3203_v16, 6 }
 0xaa0   :  { %1130 = vrot.lane.b32.xlu1 %v1129_v17, %s2883_s16 }
 0xaa1   :  { %v1086_v19 = vpop.permute.xlu0 %1085 }
 0xaa2   :  { %v1088_v21 = vadd.f32 %v1086_v19, %v3067_v63  ;;  %v1095_v33 = vadd.f32 %v1086_v19, %v3069_v3 }
 0xaa4   :  { %1102 = vrot.lane.b32.xlu1 %v1081_v7, %s2873_s27  ;;  %v2185_v22 = vmul.f32 -1.442695, %v1088_v21  ;;  %v2186_v37 = vmul.f32 -1.442695, %v1095_v33 }
 0xaa6   :  { %2678 = vpow2.f32 %v2185_v22 }
 0xab0   :  { %v2679_v23 = vpop.eup %2678 }
 0xab1   :  { %v1092_v25 = vadd.f32 1.0, %v2679_v23 }
 0xab3   :  { %2680 = vrcp.f32 %v1092_v25 }
 0xabd   :  { %v2681_v27 = vpop.eup %2680 }
 0xb12   :  { %v1131_v26 = vpop.permute.xlu1 %1130 }
 0xb13   :  { %2395 = vmatmul.mubr.msk.f32.vlgmr.msra.gmra.mrb[8].mxu1 %vm135_vm1, %v1131_v26 }
 0xb14   :  { %2563 = vmatpush3.bf16.msra.mxu1 %v2998_v14  ;;  %2416 = vmatprep.mubr.msk.f32.mxu1 %vm2879_vm0, %v2880_v1 }
 0xb15   :  { %2564 = vmatprep.subr.bf16.mxu1 %v2878_v0 }
 0xb16   :  { %v1103_v28 = vpop.permute.xlu1 %1102 }
 0xb17   :  { %v1105_v29 = vmul.f32 %v2681_v27, %v1103_v28 }
 0xb18   :  { %2566 = vmatpush3.bf16.msra.mxu1 %v3020_v24 }
 0xb19   :  { %1107 = vrot.lane.b32.xlu0 %v1105_v29, %s2882_s14  ;;  %2573 = vmatprep.subr.bf16.mxu1 %v2878_v0 }
 0xb8b   :  { %v1108_v30 = vpop.permute.xlu0 %1107 }
 0xb8c   :  { %v1110_v31 = vadd.f32 %v1108_v30, %v3069_v3 }
 0xb8e   :  { %2682 = vtanh.f32 %v1110_v31 }
 0xb8f   :  { %2684 = vpow2.f32 %v2186_v37 }
 0xb98   :  { %v2683_v32 = vpop.eup %2682 }
 0xb99   :  { %1114 = vrot.lane.b32.xlu0 %v2683_v32, %s2883_s16  ;;  %v2685_v38 = vpop.eup %2684 }
 0xb9a   :  { %v1099_v39 = vadd.f32 1.0, %v2685_v38 }
 0xb9c   :  { %2686 = vrcp.f32 %v1099_v39 }
 0xba6   :  { %v2687_v40 = vpop.eup %2686 }
 0xba7   :  { %v1112_v41 = vsub.f32 1.0, %v2687_v40  ;;  %v1119_v44 = vmul.f32 %v2687_v40, %v1011_v54 }
 0xbe6   :  { %v1200_v34 = vpop.f32.mrb[8].mxu1 }
 0xbe7   :  { %v1201_v35 = vadd.f32 %v3057_v51, %v1200_v34  ;;  %v2396_v36 = vpop.f32.mrb[9].mxu1 }
 0xbe9   :  { %1212 = vrot.lane.b32.xlu1 %v1201_v35, %s2882_s14  ;;  %v1204_v3 = vadd.f32 %v1201_v35, %v3067_v63 }
 0xbeb   :  { %v2188_v47 = vmul.f32 -1.442695, %v1204_v3 }
 0xbed   :  { %2688 = vpow2.f32 %v2188_v47 }
 0xbf7   :  { %v2689_v48 = vpop.eup %2688 }
 0xbf8   :  { %v1208_v52 = vadd.f32 1.0, %v2689_v48 }
 0xbfa   :  { %2690 = vrcp.f32 %v1208_v52 }
 0xc04   :  { %v2691_v54 = vpop.eup %2690 }
 0xc05   :  { %v1222_v4 = vsub.f32 1.0, %v2691_v54  ;;  %v1229_v7 = vmul.f32 %v2691_v54, %v1129_v17 }
 0xc0b   :  { %v1115_v43 = vpop.permute.xlu0 %1114 }
 0xc0c   :  { %v1117_v45 = vmul.f32 %v1115_v43, %v1112_v41 }
 0xc0e   :  { %v3226_v46 = vadd.f32 %v1119_v44, %v1117_v45 }
 0xc10   :  { %1128 = vst.msk [vmem:[#allocation8 + $0x8] sm:$0x3] %vm449_vm2, %v3226_v46  ;;  %2406 = vmatmul.mubr.msk.f32.vlgmr.msra.gmra.mrb[12].mxu0 %vm135_vm1, %v3226_v46  ;;  %v1339_v38 = vrot.slane %v3226_v46, 2 }
 0xc11   :  { %2569 = vmatpush3.bf16.msra.mxu0 %v3025_v42  ;;  %2427 = vmatprep.mubr.msk.f32.mxu0 %vm2879_vm0, %v2880_v1 }
 0xc12   :  { %2570 = vmatprep.subr.bf16.mxu0 %v2878_v0 }
 0xc15   :  { %2572 = vmatpush3.bf16.msra.mxu0 %v3033_v49 }
 0xc16   :  { %2579 = vmatprep.subr.bf16.mxu0 %v2878_v0 }
 0xc5b   :  { %v1213_v53 = vpop.permute.xlu1 %1212 }
 0xc5c   :  { %v1215_v55 = vmul.f32 %v2691_v54, %v1213_v53 }
 0xc5e   :  { %1217 = vrot.lane.b32.xlu1 %v1215_v55, %s2882_s14 }
 0xcd0   :  { %v1218_v56 = vpop.permute.xlu1 %1217 }
 0xcd1   :  { %v1220_v57 = vadd.f32 %v1218_v56, %v3067_v63 }
 0xcd3   :  { %2692 = vtanh.f32 %v1220_v57 }
 0xcdd   :  { %v2693_v58 = vpop.eup %2692 }
 0xcde   :  { %1224 = vrot.lane.b32.xlu0 %v2693_v58, %s2883_s16 }
 0xce3   :  { %v1300_v59 = vpop.f32.mrb[12].mxu0 }
 0xce4   :  { %v1301_v61 = vadd.f32 %v3077_v11, %v1300_v59  ;;  %v2407_v62 = vpop.f32.mrb[13].mxu0 }
 0xce6   :  { %v1305_v2 = vrot.slane %v1301_v61, 2 }
 0xce8   :  { %1306 = vrot.lane.b32.xlu0 %v1305_v2, %s2883_s16 }
 0xd50   :  { %v1225_v6 = vpop.permute.xlu0 %1224 }
 0xd51   :  { %v1227_v8 = vmul.f32 %v1225_v6, %v1222_v4 }
 0xd53   :  { %v3246_v9 = vadd.f32 %v1229_v7, %v1227_v8 }
 0xd55   :  { %1344 = vrot.lane.b32.xlu1 %v3246_v9, %s2883_s16  ;;  %v1449_v62 = vrot.slane %v3246_v9, 6 }
 0xd59   :  { %1323 = vrot.lane.b32.xlu1 %v1305_v2, %s2873_s27 }
 0xd5a   :  { %v1307_v10 = vpop.permute.xlu0 %1306 }
 0xd5b   :  { %v1309_v12 = vadd.f32 %v1307_v10, %v3071_v5  ;;  %v1316_v28 = vadd.f32 %v1307_v10, %v3065_v60 }
 0xd5d   :  { %v2190_v13 = vmul.f32 -1.442695, %v1309_v12  ;;  %v2191_v32 = vmul.f32 -1.442695, %v1316_v28 }
 0xd5f   :  { %2694 = vpow2.f32 %v2190_v13 }
 0xd69   :  { %v2695_v15 = vpop.eup %2694 }
 0xd6a   :  { %v1313_v19 = vadd.f32 1.0, %v2695_v15 }
 0xd6c   :  { %2696 = vrcp.f32 %v1313_v19 }
 0xd76   :  { %v2697_v17 = vpop.eup %2696 }
 0xdc7   :  { %v1345_v21 = vpop.permute.xlu1 %1344 }
 0xdc8   :  { %1348 = vst.msk [vmem:[#allocation7 + $0x8] sm:$0x3] %vm449_vm2, %v1345_v21  ;;  %2417 = vmatmul.mubr.msk.f32.vlgmr.msra.gmra.mrb[10].mxu1 %vm135_vm1, %v1345_v21 }
 0xdc9   :  { %2575 = vmatpush3.bf16.msra.mxu1 %v2998_v14  ;;  %2438 = vmatprep.mubr.msk.f32.mxu1 %vm2879_vm0, %v2880_v1 }
 0xdca   :  { %2576 = vmatprep.subr.bf16.mxu1 %v2878_v0 }
 0xdcb   :  { %v1324_v22 = vpop.permute.xlu1 %1323 }
 0xdcc   :  { %v1326_v23 = vmul.f32 %v2697_v17, %v1324_v22 }
 0xdcd   :  { %2578 = vmatpush3.bf16.msra.mxu1 %v3020_v24 }
 0xdce   :  { %1328 = vrot.lane.b32.xlu0 %v1326_v23, %s2882_s14  ;;  %2585 = vmatprep.subr.bf16.mxu1 %v2878_v0 }
 0xe40   :  { %v1329_v25 = vpop.permute.xlu0 %1328 }
 0xe41   :  { %v1331_v26 = vadd.f32 %v1329_v25, %v3065_v60 }
 0xe43   :  { %2698 = vtanh.f32 %v1331_v26 }
 0xe44   :  { %2700 = vpow2.f32 %v2191_v32 }
 0xe4d   :  { %v2699_v27 = vpop.eup %2698 }
 0xe4e   :  { %1335 = vrot.lane.b32.xlu0 %v2699_v27, %s2883_s16  ;;  %v2701_v34 = vpop.eup %2700 }
 0xe4f   :  { %v1320_v35 = vadd.f32 1.0, %v2701_v34 }
 0xe51   :  { %2702 = vrcp.f32 %v1320_v35 }
 0xe5b   :  { %v2703_v36 = vpop.eup %2702 }
 0xe5c   :  { %v1333_v37 = vsub.f32 1.0, %v2703_v36  ;;  %v1341_v40 = vmul.f32 %v2703_v36, %v1339_v38 }
 0xe9b   :  { %v1419_v29 = vpop.f32.mrb[10].mxu1 }
 0xe9c   :  { %v1420_v30 = vadd.f32 %v3057_v51, %v1419_v29  ;;  %v2418_v31 = vpop.f32.mrb[11].mxu1 }
 0xe9e   :  { %v1424_v33 = vrot.slane %v1420_v30, 6 }
 0xea0   :  { %1433 = vrot.lane.b32.xlu1 %v1424_v33, %s2882_s14  ;;  %v1426_v45 = vadd.f32 %v1424_v33, %v3067_v63 }
 0xea2   :  { %v2193_v46 = vmul.f32 -1.442695, %v1426_v45 }
 0xea4   :  { %2704 = vpow2.f32 %v2193_v46 }
 0xeae   :  { %v2705_v3 = vpop.eup %2704 }
 0xeaf   :  { %v1430_v47 = vadd.f32 1.0, %v2705_v3 }
 0xeb1   :  { %2706 = vrcp.f32 %v1430_v47 }
 0xebb   :  { %v2707_v48 = vpop.eup %2706 }
 0xebc   :  { %v1443_v2 = vsub.f32 1.0, %v2707_v48  ;;  %v1451_v6 = vmul.f32 %v2707_v48, %v1449_v62 }
 0xec0   :  { %v1336_v39 = vpop.permute.xlu0 %1335 }
 0xec1   :  { %v1338_v41 = vmul.f32 %v1336_v39, %v1333_v37 }
 0xec3   :  { %v3267_v43 = vadd.f32 %v1341_v40, %v1338_v41 }
 0xec5   :  { %v1454_v44 = vrot.slane %v3267_v43, 6  ;;  %1350 = vst.msk [vmem:[#allocation8] sm:$0xc0] %vm452_vm3, %v3267_v43  ;;  %v1562_v36 = vrot.slane %v3267_v43, 2 }
 0xec7   :  { %2428 = vmatmul.mubr.msk.f32.vlgmr.msra.gmra.mrb[14].mxu0 %vm135_vm1, %v1454_v44 }
 0xec8   :  { %2581 = vmatpush3.bf16.msra.mxu0 %v3025_v42  ;;  %2449 = vmatprep.mubr.msk.f32.mxu0 %vm2879_vm0, %v2880_v1 }
 0xec9   :  { %2582 = vmatprep.subr.bf16.mxu0 %v2878_v0 }
 0xecc   :  { %2584 = vmatpush3.bf16.msra.mxu0 %v3033_v49 }
 0xecd   :  { %2591 = vmatprep.subr.bf16.mxu0 %v2878_v0 }
 0xf12   :  { %v1434_v52 = vpop.permute.xlu1 %1433 }
 0xf13   :  { %v1436_v54 = vmul.f32 %v2707_v48, %v1434_v52 }
 0xf15   :  { %1438 = vrot.lane.b32.xlu1 %v1436_v54, %s2882_s14 }
 0xf87   :  { %v1439_v53 = vpop.permute.xlu1 %1438 }
 0xf88   :  { %v1441_v55 = vadd.f32 %v1439_v53, %v3067_v63 }
 0xf8a   :  { %2708 = vtanh.f32 %v1441_v55 }
 0xf94   :  { %v2709_v56 = vpop.eup %2708 }
 0xf95   :  { %1445 = vrot.lane.b32.xlu0 %v2709_v56, %s2883_s16 }
 0xf9a   :  { %v1523_v57 = vpop.f32.mrb[14].mxu0 }
 0xf9b   :  { %v1524_v58 = vadd.f32 %v3077_v11, %v1523_v57  ;;  %v2429_v59 = vpop.f32.mrb[15].mxu0 }
 0xf9d   :  { %v1528_v61 = vrot.slane %v1524_v58, 4 }
 0xf9f   :  { %1529 = vrot.lane.b32.xlu0 %v1528_v61, %s2883_s16 }
0x1007   :  { %v1446_v4 = vpop.permute.xlu0 %1445 }
0x1008   :  { %v1448_v7 = vmul.f32 %v1446_v4, %v1443_v2 }
0x100a   :  { %v3286_v8 = vadd.f32 %v1451_v6, %v1448_v7 }
0x100c   :  { %v1574_v10 = vrot.slane %v3286_v8, 2  ;;  %v1675_v57 = vrot.slane %v3286_v8, 6 }
0x100e   :  { %1575 = vrot.lane.b32.xlu1 %v1574_v10, %s2883_s16 }
0x1011   :  { %v1530_v12 = vpop.permute.xlu0 %1529 }
0x1012   :  { %1546 = vrot.lane.b32.xlu1 %v1528_v61, %s2873_s27  ;;  %v1532_v13 = vadd.f32 %v1530_v12, %v3071_v5 }
0x1014   :  { %v2195_v15 = vmul.f32 -1.442695, %v1532_v13 }
0x1016   :  { %2710 = vpow2.f32 %v2195_v15 }
0x1020   :  { %v2711_v19 = vpop.eup %2710 }
0x1021   :  { %v1536_v21 = vadd.f32 1.0, %v2711_v19 }
0x1023   :  { %2712 = vrcp.f32 %v1536_v21 }
0x102d   :  { %v2713_v17 = vpop.eup %2712 }
0x1080   :  { %v1576_v9 = vpop.permute.xlu1 %1575 }
0x1081   :  { %2439 = vmatmul.mubr.msk.f32.vlgmr.msra.gmra.mrb[12].mxu1 %vm135_vm1, %v1576_v9 }
0x1082   :  { %2587 = vmatpush3.bf16.msra.mxu1 %v2998_v14  ;;  %2460 = vmatprep.mubr.msk.f32.mxu1 %vm2879_vm0, %v2880_v1  ;;  %v1539_v14 = vadd.f32 %v1530_v12, %v3065_v60 }
0x1083   :  { %2588 = vmatprep.subr.bf16.mxu1 %v2878_v0 }
0x1084   :  { %v1547_v22 = vpop.permute.xlu1 %1546  ;;  %v2196_v31 = vmul.f32 -1.442695, %v1539_v14 }
0x1085   :  { %v1549_v23 = vmul.f32 %v2713_v17, %v1547_v22 }
0x1086   :  { %2590 = vmatpush3.bf16.msra.mxu1 %v3020_v24 }
0x1087   :  { %1551 = vrot.lane.b32.xlu0 %v1549_v23, %s2882_s14  ;;  %2597 = vmatprep.subr.bf16.mxu1 %v2878_v0 }
0x10f9   :  { %v1552_v25 = vpop.permute.xlu0 %1551 }
0x10fa   :  { %v1554_v26 = vadd.f32 %v1552_v25, %v3065_v60  ;;  %v2752_v25 = vld [vmem:[%s3479_s4] ss:$0 sm:$0xff] }
0x10fc   :  { %2714 = vtanh.f32 %v1554_v26 }
0x10fd   :  { %2716 = vpow2.f32 %v2196_v31 }
0x1106   :  { %v2715_v27 = vpop.eup %2714 }
0x1107   :  { %1558 = vrot.lane.b32.xlu1 %v2715_v27, %s2883_s16  ;;  %v2717_v24 = vpop.eup %2716 }
0x1108   :  { %v1543_v33 = vadd.f32 1.0, %v2717_v24 }
0x110a   :  { %2718 = vrcp.f32 %v1543_v33 }
0x1114   :  { %v2719_v34 = vpop.eup %2718 }
0x1115   :  { %v1556_v35 = vsub.f32 1.0, %v2719_v34  ;;  %v1564_v38 = vmul.f32 %v2719_v34, %v1562_v36 }
0x1154   :  { %v1645_v28 = vpop.f32.mrb[12].mxu1 }
0x1155   :  { %v1646_v29 = vadd.f32 %v3057_v51, %v1645_v28  ;;  %v2440_v30 = vpop.f32.mrb[13].mxu1 }
0x1157   :  { %v1650_v32 = vrot.slane %v1646_v29, 4 }
0x1159   :  { %1659 = vrot.lane.b32.xlu0 %v1650_v32, %s2882_s14  ;;  %v1652_v41 = vadd.f32 %v1650_v32, %v3067_v63 }
0x115b   :  { %v2198_v43 = vmul.f32 -1.442695, %v1652_v41 }
0x115d   :  { %2720 = vpow2.f32 %v2198_v43 }
0x1167   :  { %v2721_v44 = vpop.eup %2720 }
0x1168   :  { %v1656_v45 = vadd.f32 1.0, %v2721_v44 }
0x116a   :  { %2722 = vrcp.f32 %v1656_v45 }
0x1174   :  { %v2723_v46 = vpop.eup %2722 }
0x1175   :  { %v1669_v56 = vsub.f32 1.0, %v2723_v46  ;;  %v1677_v59 = vmul.f32 %v2723_v46, %v1675_v57 }
0x1179   :  { %v1559_v37 = vpop.permute.xlu1 %1558 }
0x117a   :  { %v1561_v39 = vmul.f32 %v1559_v37, %v1556_v35 }
0x117c   :  { %v3306_v40 = vadd.f32 %v1564_v38, %v1561_v39 }
0x117e   :  { %v1680_v51 = vrot.slane %v3306_v40, 4  ;;  %1573 = vst.msk [vmem:[#allocation8] sm:$0x30] %vm677_vm4, %v3306_v40  ;;  %v1788_v32 = vrot.slane %v3306_v40, 2 }
0x1180   :  { %2450 = vmatmul.mubr.msk.f32.vlgmr.msra.gmra.mrb[16].mxu0 %vm135_vm1, %v1680_v51 }
0x1181   :  { %2593 = vmatpush3.bf16.msra.mxu0 %v3025_v42  ;;  %2471 = vmatprep.mubr.msk.f32.mxu0 %vm2879_vm0, %v2880_v1 }
0x1182   :  { %2594 = vmatprep.subr.bf16.mxu0 %v2878_v0 }
0x1185   :  { %2596 = vmatpush3.bf16.msra.mxu0 %v3033_v49 }
0x11cb   :  { %v1660_v3 = vpop.permute.xlu0 %1659 }
0x11cc   :  { %v1662_v47 = vmul.f32 %v2723_v46, %v1660_v3  ;;  %v2027_v46 = vld [vmem:[%s3482_s7] sm:$0xff]  ;;  %v2028_v3 = vld [vmem:[%s3482_s7 + $0x8] sm:$0xff] }
0x11ce   :  { %1664 = vrot.lane.b32.xlu1 %v1662_v47, %s2882_s14  ;;  %v2029_v47 = vld [vmem:[%s3482_s7 + $0x10] sm:$0xff] }
0x1240   :  { %v1665_v42 = vpop.permute.xlu1 %1664 }
0x1241   :  { %v1667_v48 = vadd.f32 %v1665_v42, %v3067_v63  ;;  %v2598_v42 = vpack.c.bf16 %v2028_v3, %v2027_v46 }
0x1243   :  { %2724 = vtanh.f32 %v1667_v48  ;;  %v2030_v48 = vld [vmem:[%s3482_s7 + $0x18] sm:$0xff] }
0x124d   :  { %v2725_v52 = vpop.eup %2724 }
0x124e   :  { %1671 = vrot.lane.b32.xlu0 %v2725_v52, %s2883_s16 }
0x1253   :  { %v1749_v49 = vpop.f32.mrb[16].mxu0 }
0x1254   :  { %v1750_v54 = vadd.f32 %v3077_v11, %v1749_v49  ;;  %v2451_v53 = vpop.f32.mrb[17].mxu0  ;;  %v2031_v49 = vld [vmem:[%s3482_s7 + $0x20] sm:$0xff] }
0x1256   :  { %v1754_v55 = vrot.slane %v1750_v54, 6  ;;  %v2032_v54 = vld [vmem:[%s3482_s7 + $0x28] sm:$0xff] }
0x1257   :  { %v2604_v53 = vpack.c.bf16 %v2032_v54, %v2031_v49 }
0x1258   :  { %1755 = vrot.lane.b32.xlu0 %v1754_v55, %s2883_s16 }
0x12c0   :  { %v1672_v58 = vpop.permute.xlu0 %1671 }
0x12c1   :  { %v1674_v61 = vmul.f32 %v1672_v58, %v1669_v56  ;;  %v2753_v56 = vld [vmem:[%s3481_s6] ss:$0 sm:$0xff] }
0x12c3   :  { %v3324_v62 = vadd.f32 %v1677_v59, %v1674_v61  ;;  %v2033_v59 = vld [vmem:[%s3482_s7 + $0x30] sm:$0xff] }
0x12c5   :  { %v1800_v2 = vrot.slane %v3324_v62, 4 }
0x12c7   :  { %1801 = vrot.lane.b32.xlu1 %v1800_v2, %s2883_s16 }
0x12ca   :  { %v1756_v4 = vpop.permute.xlu0 %1755 }
0x12cb   :  { %1772 = vrot.lane.b32.xlu1 %v1754_v55, %s2873_s27  ;;  %v1758_v11 = vadd.f32 %v1756_v4, %v3071_v5  ;;  %v1765_v22 = vadd.f32 %v1756_v4, %v3065_v60  ;;  %v1901_v4 = vrot.slane %v3324_v62, 6 }
0x12cd   :  { %v2200_v6 = vmul.f32 -1.442695, %v1758_v11  ;;  %v2201_v27 = vmul.f32 -1.442695, %v1765_v22 }
0x12cf   :  { %2726 = vpow2.f32 %v2200_v6 }
0x12d9   :  { %v2727_v7 = vpop.eup %2726 }
0x12da   :  { %v1762_v10 = vadd.f32 1.0, %v2727_v7 }
0x12dc   :  { %2728 = vrcp.f32 %v1762_v10 }
0x12e6   :  { %v2729_v13 = vpop.eup %2728 }
0x1339   :  { %v1802_v12 = vpop.permute.xlu1 %1801 }
0x133a   :  { %2461 = vmatmul.mubr.msk.f32.vlgmr.msra.gmra.mrb[14].mxu1 %vm135_vm1, %v1802_v12 }
0x133b   :  { %2490 = vmatprep.mubr.msk.f32.mxu1 %vm2879_vm0, %v2880_v1  ;;  %2599 = vmatpush3.bf16.msra.mxu1 %v2598_v42 }
0x133c   :  { %2600 = vmatprep.subr.bf16.mxu1 %v2878_v0 }
0x133d   :  { %v1773_v15 = vpop.permute.xlu1 %1772 }
0x133e   :  { %v1775_v19 = vmul.f32 %v2729_v13, %v1773_v15 }
0x1340   :  { %1777 = vrot.lane.b32.xlu0 %v1775_v19, %s2882_s14 }
0x13b2   :  { %v1778_v21 = vpop.permute.xlu0 %1777 }
0x13b3   :  { %v1780_v9 = vadd.f32 %v1778_v21, %v3065_v60 }
0x13b5   :  { %2730 = vtanh.f32 %v1780_v9 }
0x13b6   :  { %2732 = vpow2.f32 %v2201_v27 }
0x13bf   :  { %v2731_v17 = vpop.eup %2730 }
0x13c0   :  { %1784 = vrot.lane.b32.xlu1 %v2731_v17, %s2883_s16  ;;  %v2733_v28 = vpop.eup %2732 }
0x13c1   :  { %v1769_v29 = vadd.f32 1.0, %v2733_v28 }
0x13c3   :  { %2734 = vrcp.f32 %v1769_v29 }
0x13cd   :  { %v2735_v30 = vpop.eup %2734 }
0x13ce   :  { %v1782_v31 = vsub.f32 1.0, %v2735_v30  ;;  %v1790_v33 = vmul.f32 %v2735_v30, %v1788_v32 }
0x140d   :  { %v1871_v23 = vpop.f32.mrb[14].mxu1 }
0x140e   :  { %v1872_v1 = vadd.f32 %v2752_v25, %v1871_v23  ;;  %v2462_v26 = vpop.f32.mrb[15].mxu1 }
0x1410   :  { %v1876_v14 = vrot.slane %v1872_v1, 2 }
0x1412   :  { %1885 = vrot.lane.b32.xlu0 %v1876_v14, %s2882_s14  ;;  %v1878_v37 = vadd.f32 %v1876_v14, %v3067_v63 }
0x1414   :  { %v2203_v38 = vmul.f32 -1.442695, %v1878_v37 }
0x1416   :  { %2736 = vpow2.f32 %v2203_v38 }
0x1420   :  { %v2737_v39 = vpop.eup %2736 }
0x1421   :  { %v1882_v40 = vadd.f32 1.0, %v2737_v39 }
0x1423   :  { %2738 = vrcp.f32 %v1882_v40 }
0x142d   :  { %v2739_v51 = vpop.eup %2738 }
0x142e   :  { %v1895_v2 = vsub.f32 1.0, %v2739_v51  ;;  %v1903_v6 = vmul.f32 %v2739_v51, %v1901_v4 }
0x1432   :  { %v1785_v24 = vpop.permute.xlu1 %1784 }
0x1433   :  { %v1787_v34 = vmul.f32 %v1785_v24, %v1782_v31 }
0x1435   :  { %v3342_v35 = vadd.f32 %v1790_v33, %v1787_v34 }
0x1437   :  { %v1906_v36 = vrot.slane %v3342_v35, 2  ;;  %1799 = vst.msk [vmem:[#allocation8] sm:$0xc] %vm674_vm5, %v3342_v35 }
0x1439   :  { %2472 = vmatmul.mubr.msk.f32.vlgmr.msra.gmra.mrb[18].mxu0 %vm135_vm1, %v1906_v36 }
0x1484   :  { %v1886_v41 = vpop.permute.xlu0 %1885 }
0x1485   :  { %v1888_v43 = vmul.f32 %v2739_v51, %v1886_v41 }
0x1487   :  { %1890 = vrot.lane.b32.xlu1 %v1888_v43, %s2882_s14 }
0x14f9   :  { %v1891_v44 = vpop.permute.xlu1 %1890 }
0x14fa   :  { %v1893_v45 = vadd.f32 %v1891_v44, %v3067_v63  ;;  %v2601_v63 = vpack.c.bf16 %v2030_v48, %v2029_v47 }
0x14fc   :  { %2740 = vtanh.f32 %v1893_v45  ;;  %2602 = vmatpush3.bf16.msra.mxu1 %v2601_v63 }
0x14fd   :  { %2603 = vmatprep.subr.bf16.mxu1 %v2878_v0 }
0x1500   :  { %2605 = vmatpush3.bf16.msra.mxu1 %v2604_v53 }
0x1501   :  { %2606 = vmatprep.subr.bf16.mxu1 %v2878_v0 }
0x1506   :  { %v2741_v52 = vpop.eup %2740 }
0x1507   :  { %1897 = vrot.lane.b32.xlu0 %v2741_v52, %s2883_s16 }
0x150b   :  { %2023 = vrot.lane.b32.xlu0 %v3102_v50, %s2873_s27  ;;  %v2034_v50 = vld [vmem:[%s3482_s7 + $0x38] sm:$0xff] }
0x150c   :  { %v1975_v55 = vpop.f32.mrb[18].mxu0  ;;  %v2607_v61 = vpack.c.bf16 %v2034_v50, %v2033_v59 }
0x150d   :  { %v1976_v57 = vadd.f32 %v2753_v56, %v1975_v55  ;;  %v2473_v58 = vpop.f32.mrb[19].mxu0 }
0x150e   :  { %2608 = vmatpush3.bf16.msra.mxu1 %v2607_v61 }
0x150f   :  { %1997 = vrot.lane.b32.xlu0 %v1976_v57, %s2873_s27 }
0x1579   :  { %v1898_v11 = vpop.permute.xlu0 %1897 }
0x157a   :  { %v1900_v7 = vmul.f32 %v1898_v11, %v1895_v2 }
0x157c   :  { %v1904_v10 = vadd.f32 %v1903_v6, %v1900_v7 }
0x157d   :  { %v2024_v0 = vpop.permute.xlu0 %2023 }
0x157e   :  { %2017 = vrot.lane.b32.xlu1 %v1904_v10, %s2883_s16 }
0x1581   :  { %v1998_v25 = vpop.permute.xlu0 %1997 }
0x1582   :  { %1980 = vrot.lane.b32.xlu1 %v1976_v57, %s2883_s16 }
0x15f0   :  { %v2018_v12 = vpop.permute.xlu1 %2017 }
0x15f1   :  { %2021 = vst.msk [vmem:[#allocation7 + $0x8] sm:$0xc0] %vm452_vm3, %v2018_v12  ;;  %v2026_v13 = vsel %vm135_vm1, %v2018_v12, %v2024_v0 }
0x15f2   :  { %v2043_v15 = vrot.slane %v2026_v13, 6 }
0x15f4   :  { %2491 = vmatmul.mubr.msk.f32.vlgmr.msra.gmra.mrb[16].mxu1 %vm2044_vm6, %v2043_v15  ;;  %v1981_v19 = vpop.permute.xlu1 %1980 }
0x15f5   :  { %v1983_v21 = vadd.f32 %v1981_v19, %v3071_v5  ;;  %v1990_v31 = vadd.f32 %v1981_v19, %v3065_v60 }
0x15f7   :  { %v2205_v9 = vmul.f32 -1.442695, %v1983_v21  ;;  %v2206_v32 = vmul.f32 -1.442695, %v1990_v31 }
0x15f9   :  { %2742 = vpow2.f32 %v2205_v9 }
0x1603   :  { %v2743_v17 = vpop.eup %2742 }
0x1604   :  { %v1987_v22 = vadd.f32 1.0, %v2743_v17 }
0x1606   :  { %2744 = vrcp.f32 %v1987_v22 }
0x1610   :  { %v2745_v23 = vpop.eup %2744 }
0x1611   :  { %v2000_v1 = vmul.f32 %v2745_v23, %v1998_v25 }
0x1613   :  { %2002 = vrot.lane.b32.xlu1 %v2000_v1, %s2882_s14  ;;  %s2884_s14 = smov [#allocation8]  }
0x1614   :  { %s2135_s15 = sshll.u32 %s2884_s14, 4  ;;  %s2136_s15 = int_to_ptr.vmem [resolvable:$true] %s2135_s15 }
0x1615   :  { %s2798_s4 = scalar_lea.vmem %s2136_s15, 256  ;;  %p2803_p3 = scmp.lt.s32.totalorder %s2136_s15, %s2136_s15 }
0x1616   :  { %p2799_p2 = scmp.ne.s32.totalorder %s2136_s15, %s2798_s4  ;;  %p2804_p4 = scmp.lt.s32.totalorder %s2798_s4, %s2798_s4 }
0x1617   :  { %670 = vrot.lane.b32.xlu1 %v3123_v20, %s2883_s16  ;;  %v2207_v20 = vld [vmem:[%s3483_s8] ss:$0 sm:$0xff]  ;;  %s2885_s8 = smov [#allocation10]  }
0x1618   :  { %p2805_p5 = por %p2804_p4, %p2803_p3 }
0x161a   :  { %p2806_p6 = pnand %p2805_p5, %p2799_p2 }
0x161b   :  { %1122 = vrot.lane.b32.xlu1 %v3203_v16, %s2883_s16 }
0x161f   :  { %1793 = vrot.lane.b32.xlu1 %v3324_v62, %s2883_s16 }
0x1685   :  { %v2003_v5 = vpop.permute.xlu1 %2002 }
0x1686   :  { %v2005_v26 = vadd.f32 %v2003_v5, %v3065_v60 }
0x1688   :  { %2746 = vtanh.f32 %v2005_v26 }
0x1689   :  { %v671_v27 = vpop.permute.xlu1 %670  ;;  %2748 = vpow2.f32 %v2206_v32 }
0x168a   :  { %675 = vst.msk [vmem:[#allocation7] sm:$0xc] %vm674_vm5, %v671_v27 }
0x168d   :  { %v1123_v14 = vpop.permute.xlu1 %1122 }
0x168e   :  { %1126 = vst.msk [vmem:[#allocation7] sm:$0xc0] %vm452_vm3, %v1123_v14 }
0x1691   :  { %v1794_v28 = vpop.permute.xlu1 %1793 }
0x1692   :  { %v2747_v29 = vpop.eup %2746  ;;  %1797 = vst.msk [vmem:[#allocation7 + $0x8] sm:$0x30] %vm677_vm4, %v1794_v28 }
0x1693   :  { %2009 = vrot.lane.b32.xlu0 %v2747_v29, %s2883_s16  ;;  %v2749_v24 = vpop.eup %2748 }
0x1694   :  { %v1994_v33 = vadd.f32 1.0, %v2749_v24 }
0x1696   :  { %2750 = vrcp.f32 %v1994_v33 }
0x1697   :  { %898 = vrot.lane.b32.xlu0 %v3162_v18, %s2883_s16 }
0x169b   :  { %1567 = vrot.lane.b32.xlu0 %v3286_v8, %s2883_s16  ;;  %s2148_s16 = sshll.u32 %s2885_s8, 4  ;;  %s3416_s16 = int_to_ptr.vmem [resolvable:$true] %s2148_s16 }
0x16a0   :  { %v2751_v18 = vpop.eup %2750 }
0x16a1   :  { %v2007_v34 = vsub.f32 1.0, %v2751_v18  ;;  %v2014_v8 = vmul.f32 %v2751_v18, %v1906_v36 }
0x16c7   :  { %v2113_v16 = vpop.f32.mrb[16].mxu1 }
0x16c8   :  { %v2114_v62 = vadd.f32 %v2207_v20, %v2113_v16  ;;  %v2492_v30 = vpop.f32.mrb[17].mxu1 }
0x16ca   :  { %2117 = vst.msk [vmem:[#allocation10] sm:$0x3] %vm449_vm2, %v2114_v62 }
0x1705   :  { %v2010_v37 = vpop.permute.xlu0 %2009 }
0x1706   :  { %v2012_v38 = vmul.f32 %v2010_v37, %v2007_v34 }
0x1708   :  { %v2015_v39 = vadd.f32 %v2014_v8, %v2012_v38 }
0x1709   :  { %v899_v60 = vpop.permute.xlu0 %898 }
0x170a   :  { %2022 = vst.msk [vmem:[#allocation8] sm:$0x3] %vm449_vm2, %v2015_v39 }
0x170b   :  { %902 = vst.msk [vmem:[#allocation7] sm:$0x30] %vm677_vm4, %v899_v60 }
0x170c   :  { %2809 = shalt.err (!%p2806_p6)
}
0x170d   :  { %s2810_s22 = scalar_lea.hbm %s3485_s10, 256 }
0x170e   :  { %p2811_p7 = scmp.ne.s32.totalorder %s3485_s10, %s2810_s22  ;;  %p2814_p8 = scmp.lt.u32.totalorder %s2810_s22, %s3485_s10 }
0x1710   :  { %p2816_p9 = pnand %p2814_p8, %p2811_p7 }
0x1712   :  { %2819 = shalt.err (!%p2816_p9)
}
0x1713   :  { %2141 = dma.vmem_to_hbm [thread:$0]  %s2136_s15, 256, %s3485_s10, [#allocation9], %s2873_s27, %s2873_s27, %s2874_s28  }
0x1714   :  { %s2820_s26 = scalar_lea.vmem %s3416_s16, 32  ;;  %p2825_p11 = scmp.lt.s32.totalorder %s3416_s16, %s3416_s16 }
0x1715   :  { %p2821_p10 = scmp.ne.s32.totalorder %s3416_s16, %s2820_s26  ;;  %p2826_p12 = scmp.lt.s32.totalorder %s2820_s26, %s2820_s26 }
0x1717   :  { %p2827_p13 = por %p2826_p12, %p2825_p11 }
0x1719   :  { %p2828_p0 = pnand %p2827_p13, %p2821_p10 }
0x171b   :  { %2831 = shalt.err (!%p2828_p0)
}
0x171c   :  { %s2832_s1 = scalar_lea.hbm %s3486_s11, 32 }
0x171d   :  { %p2833_p1 = scmp.ne.s32.totalorder %s3486_s11, %s2832_s1  ;;  %p2836_p2 = scmp.lt.u32.totalorder %s2832_s1, %s3486_s11 }
0x171f   :  { %p2838_p3 = pnand %p2836_p2, %p2833_p1 }
0x1721   :  { %2841 = shalt.err (!%p2838_p3)
}
0x1722   :  { %2151 = dma.vmem_to_hbm [thread:$0]  %s3416_s16, 32, %s3486_s11, [#allocation9]   ;;  %v1568_v35 = vpop.permute.xlu0 %1567 }
0x1723   :  { %1571 = vst.msk [vmem:[#allocation7 + $0x8] sm:$0xc] %vm674_vm5, %v1568_v35  ;;  %s2842_s7 = scalar_lea.vmem %s3420_s19, 256  ;;  %p2847_p5 = scmp.lt.s32.totalorder %s3420_s19, %s3420_s19 }
0x1724   :  { %p2843_p4 = scmp.ne.s32.totalorder %s3420_s19, %s2842_s7  ;;  %p2848_p6 = scmp.lt.s32.totalorder %s2842_s7, %s2842_s7 }
0x1726   :  { %p2849_p7 = por %p2848_p6, %p2847_p5 }
0x1728   :  { %p2850_p8 = pnand %p2849_p7, %p2843_p4 }
0x172a   :  { %2853 = shalt.err (!%p2850_p8)
}
0x172b   :  { %s2854_s8 = scalar_lea.hbm %s3484_s9, 256 }
0x172c   :  { %p2855_p9 = scmp.ne.s32.totalorder %s3484_s9, %s2854_s8  ;;  %p2858_p10 = scmp.lt.u32.totalorder %s2854_s8, %s3484_s9 }
0x172e   :  { %p2860_p11 = pnand %p2858_p10, %p2855_p9 }
0x1730   :  { %2863 = shalt.err (!%p2860_p11)
}
0x1731   :  { %2129 = dma.vmem_to_hbm [thread:$0]  %s3420_s19, 256, %s3484_s9, [#allocation4], %s2873_s27, %s2873_s27, %s2874_s28  }
0x1732   :  { %2868 = dma.done.wait [#allocation4], 256  }
0x1733   :  { %2869 = vsyncadd [#allocation4], 4294967040 }
0x1734   :  { %2870 = dma.done.wait [#allocation9], 288  }
0x1735   :  { %2871 = vsyncadd [#allocation9], 4294967008 }
0x1736   :  { %2161 = vsyncpa [#allocation3], 1 }
0x1737   :  { %2162 = vsyncpa [#allocation6], 1 }
0x1738   :  { %2163 = vsyncpa [#allocation4], 1 }
0x1739   :  { %2164 = vsyncpa [#allocation9], 1 }

</bundles_post_ra>
